<compile_context>
chip_gen: v5e
topology: v5e:2x2
jax: 0.10.0
libtpu: 0.0.40
codegen_flags: <defaults>
</compile_context>

<pallas_src>
import functools
import numpy as np
import jax
import jax.numpy as jnp
from jax.experimental import pallas as pl
from jax.experimental.pallas import tpu as pltpu


# -----------------------------------------------------------------------------
# Model dimensions (synthetic MobileViT backbone + DeepLabV3 head)
# -----------------------------------------------------------------------------
C_IN, C1, D, FFN, NCLS = 4, 16, 32, 64, 1
LN_EPS = 1e-5


# -----------------------------------------------------------------------------
# Kernel 1: M-tiled matmul + bias + activation   (used for the stem conv)
# -----------------------------------------------------------------------------
def _mm_bias_act_kernel(a_ref, b_ref, bias_ref, o_ref, *, act):
    acc = jnp.dot(a_ref[...], b_ref[...], preferred_element_type=jnp.float32)
    acc = acc + bias_ref[...]
    if act == "silu":
        acc = acc * jax.nn.sigmoid(acc)
    elif act == "relu":
        acc = jnp.maximum(acc, 0.0)
    elif act == "sigmoid":
        acc = jax.nn.sigmoid(acc)
    o_ref[...] = acc.astype(o_ref.dtype)


def mm_bias_act(a, b, bias2d, act="none", tm=512):
    """out = act(a @ b + bias); a:(M,K) f32, b:(K,N) f32, bias2d:(1,N) f32."""
    M, K = a.shape
    K2, N = b.shape
    assert K == K2 and bias2d.shape == (1, N)
    tm = min(tm, M)                       # tm == M (full) or a multiple of 8
    return pl.pallas_call(
        functools.partial(_mm_bias_act_kernel, act=act),
        out_shape=jax.ShapeDtypeStruct((M, N), jnp.float32),
        grid=(pl.cdiv(M, tm),),
        in_specs=[
            pl.BlockSpec((tm, K), lambda i: (i, 0)),
            pl.BlockSpec((K, N), lambda i: (0, 0)),
            pl.BlockSpec((1, N), lambda i: (0, 0)),
        ],
        out_specs=pl.BlockSpec((tm, N), lambda i: (i, 0)),
        compiler_params=pltpu.CompilerParams(dimension_semantics=("parallel",)),
    )(a, b, bias2d)


# -----------------------------------------------------------------------------
# Kernel 2: fully fused  conv2 -> MobileViT block -> fuse conv -> seg head
#           -> sigmoid -> bilinear upsample (Kronecker matrix)
# One grid step per batch element; output is lane-dense (1, NCLS, H*W).
# -----------------------------------------------------------------------------
def _mobilevit_seg_kernel(cols_ref, wc2_ref, bc2_ref,
                          ln1_ref, wqkv_ref, bqkv_ref, wo_ref, bo_ref,
                          ln2_ref, wf1_ref, bf1_ref, wf2_ref, bf2_ref,
                          wfuse_ref, bfuse_ref,
                          wh1_ref, bh1_ref, wh2_ref, bh2_ref,
                          mupT_ref, o_ref, *, scale, eps):
    def ln(x, gb):
        mu = jnp.mean(x, axis=-1, keepdims=True)
        var = jnp.mean((x - mu) ** 2, axis=-1, keepdims=True)
        return (x - mu) * jax.lax.rsqrt(var + eps) * gb[0:1, :] + gb[1:2, :]

    def mm(x, w, b):
        return jnp.dot(x, w, preferred_element_type=jnp.float32) + b

    # --- conv2 (stride-2 3x3, pre-gathered to one lane-dense matmul) + SiLU --
    x = mm(cols_ref[0], wc2_ref[...], bc2_ref[...])       # (L, D) tokens
    x = x * jax.nn.sigmoid(x)

    # --- MobileViT transformer block (pre-norm MHSA + pre-norm FFN) ----------
    xn = ln(x, ln1_ref[...])
    q = mm(xn, wqkv_ref[0], bqkv_ref[0])                  # packed QKV weights:
    k = mm(xn, wqkv_ref[1], bqkv_ref[1])                  # single operand/DMA
    v = mm(xn, wqkv_ref[2], bqkv_ref[2])
    s = jnp.dot(q, k.T, preferred_element_type=jnp.float32) * scale
    m = jnp.max(s, axis=-1, keepdims=True)
    p = jnp.exp(s - m)
    p = p / jnp.sum(p, axis=-1, keepdims=True)
    a = jnp.dot(p, v, preferred_element_type=jnp.float32)
    a = mm(a, wo_ref[...], bo_ref[...])
    x1 = x + a
    x1n = ln(x1, ln2_ref[...])
    h = mm(x1n, wf1_ref[...], bf1_ref[...])
    h = h * jax.nn.sigmoid(h)
    h = mm(h, wf2_ref[...], bf2_ref[...])
    x2 = x1 + h

    # --- fuse conv (1x1) + SiLU   == backbone(x)[-1] --------------------------
    f = mm(x2, wfuse_ref[...], bfuse_ref[...])
    f = f * jax.nn.sigmoid(f)

    # --- seg head: 1x1 conv + ReLU, then 1x1 classifier + sigmoid ------------
    h1 = jnp.maximum(mm(f, wh1_ref[...], bh1_ref[...]), 0.0)
    # classifier has NCLS=1 output channel: do it as a lane reduction
    seg = jax.nn.sigmoid(jnp.sum(h1 * wh2_ref[...], axis=-1, keepdims=True)
                         + bh2_ref[...])                  # (L, 1)

    # --- bilinear upsample (align_corners=False) via Kronecker matrix --------
    # out[j] = sum_k M_up[j, k] * seg[k]  -> lane-dense (1, H*W) store
    up = jnp.sum(mupT_ref[...] * seg, axis=0, keepdims=True)   # (1, H*W)
    o_ref[0] = up


# -----------------------------------------------------------------------------
# Plain-JAX glue: space-to-depth im2col for stride-2 3x3 convs, upsample matrix
# -----------------------------------------------------------------------------
def s2d_im2col(x):
    """Stride-2 3x3 pad-1 conv == stride-1 2x2 conv on space-to-depth input.
    Returns the 4-tap im2col cols (N, Ho*Wo, 16*C) -- lane-dense, ~1x input
    bytes (vs. 9x for naive im2col)."""
    N, H, W, C = x.shape
    Ho, Wo = H // 2, W // 2
    xs = (x.reshape(N, Ho, 2, Wo, 2, C)
           .transpose(0, 1, 3, 2, 4, 5)
           .reshape(N, Ho, Wo, 4 * C))
    xp = jnp.pad(xs, ((0, 0), (1, 0), (1, 0), (0, 0)))    # pad=1 -> 1 s2d cell
    taps = [xp[:, di:di + Ho, dj:dj + Wo, :] for di in (0, 1) for dj in (0, 1)]
    cols = jnp.concatenate(taps, axis=-1)                  # (N, Ho, Wo, 16*C)
    return cols.reshape(N, Ho * Wo, 16 * C), Ho, Wo


def _pack_conv3x3_s2_weight(w):
    """(3,3,Cin,Cout) conv weight -> (16*Cin, Cout) matching s2d_im2col order."""
    kh, kw, ci, co = w.shape
    wp = np.zeros((2, 2, 2, 2, ci, co), np.float32)
    for di in range(2):
        for dj in range(2):
            for pi in range(2):
                for pj in range(2):
                    ki, kj = 2 * di + pi - 1, 2 * dj + pj - 1
                    if 0 <= ki < kh and 0 <= kj < kw:
                        wp[di, dj, pi, pj] = w[ki, kj]
    return jnp.asarray(wp.reshape(16 * ci, co))


def _interp_matrix(out_size, in_size):
    # PyTorch bilinear, align_corners=False
    scale = in_size / out_size
    i = np.arange(out_size, dtype=np.float64)
    src = np.maximum((i + 0.5) * scale - 0.5, 0.0)
    i0 = np.clip(np.floor(src).astype(np.int64), 0, in_size - 1)
    i1 = np.minimum(i0 + 1, in_size - 1)
    l1 = src - i0
    l0 = 1.0 - l1
    W = np.zeros((out_size, in_size), np.float32)
    W[np.arange(out_size), i0] += l0.astype(np.float32)
    W[np.arange(out_size), i1] += l1.astype(np.float32)
    return W


def _upsample_matrix_T(out_h, out_w, in_h, in_w):
    # kron(Wh, Ww): (out_h*out_w, in_h*in_w); returned transposed (K-major).
    M = np.kron(_interp_matrix(out_h, in_h), _interp_matrix(out_w, in_w))
    return jnp.asarray(M.T.astype(np.float32))


# -----------------------------------------------------------------------------
# Parameters (deterministic, pre-packed / pre-shaped once — no hot-path casts)
# -----------------------------------------------------------------------------
def init_params(key):
    def w(k, shape):
        fan_in = int(np.prod(shape[:-1]))
        return (1.0 / np.sqrt(fan_in)) * jax.random.normal(k, shape, jnp.float32)

    ks = jax.random.split(key, 16)
    ones_d = jnp.ones((D,), jnp.float32)
    zeros_d = jnp.zeros((D,), jnp.float32)
    p = {
        # strided convs, packed for the s2d/2x2 formulation
        "stem_w": _pack_conv3x3_s2_weight(np.asarray(w(ks[0], (3, 3, C_IN, C1)))),
        "stem_b": jnp.zeros((1, C1), jnp.float32),
        "conv2_w": _pack_conv3x3_s2_weight(np.asarray(w(ks[1], (3, 3, C1, D)))),
        "conv2_b": jnp.zeros((1, D), jnp.float32),
        # transformer block (QKV packed into one operand)
        "ln1": jnp.stack([ones_d, zeros_d]),                      # (2, D)
        "wqkv": jnp.stack([w(ks[2], (D, D)), w(ks[3], (D, D)), w(ks[4], (D, D))]),
        "bqkv": jnp.zeros((3, 1, D), jnp.float32),
        "wo": w(ks[5], (D, D)), "bo": jnp.zeros((1, D), jnp.float32),
        "ln2": jnp.stack([ones_d, zeros_d]),
        "ffn_w1": w(ks[6], (D, FFN)), "ffn_b1": jnp.zeros((1, FFN), jnp.float32),
        "ffn_w2": w(ks[7], (FFN, D)), "ffn_b2": jnp.zeros((1, D), jnp.float32),
        # 1x1 fuse conv + DeepLabV3-style head (NCLS = 1 -> row-vector weight)
        "fuse_w": w(ks[8], (D, D)), "fuse_b": jnp.zeros((1, D), jnp.float32),
        "head_w1": w(ks[9], (D, D)), "head_b1": jnp.zeros((1, D), jnp.float32),
        "head_w2": w(ks[10], (NCLS, D)), "head_b2": jnp.zeros((1, NCLS), jnp.float32),
    }
    return p


# -----------------------------------------------------------------------------
# Forward: NCHW in, NCHW out — matches the PyTorch wrapper semantics
# -----------------------------------------------------------------------------
def mobilevit_deeplabv3_forward(p, x_nchw):
    N, _, H, W = x_nchw.shape
    x = jnp.transpose(x_nchw, (0, 2, 3, 1)).astype(jnp.float32)   # NHWC

    # --- stem: stride-2 3x3 conv + SiLU (one Pallas matmul) ------------------
    cols1, H1, W1 = s2d_im2col(x)                                 # (N, 64, 16*C_IN)
    f1 = mm_bias_act(cols1.reshape(N * H1 * W1, 16 * C_IN),
                     p["stem_w"], p["stem_b"], act="silu")
    f1 = f1.reshape(N, H1, W1, C1)                                # (N, 8, 8, 16)

    # --- everything downstream fused into ONE pallas_call --------------------
    cols2, H2, W2 = s2d_im2col(f1)                                # (N, 16, 256)
    L = H2 * W2
    mupT = _upsample_matrix_T(H, W, H2, W2)                       # (L, H*W)

    const2 = lambda b: (0, 0)
    const3 = lambda b: (0, 0, 0)
    out = pl.pallas_call(
        functools.partial(_mobilevit_seg_kernel,
                          scale=1.0 / float(np.sqrt(D)), eps=LN_EPS),
        out_shape=jax.ShapeDtypeStruct((N, NCLS, H * W), jnp.float32),
        grid=(N,),
        in_specs=[
            pl.BlockSpec((1, L, 16 * C1), lambda b: (b, 0, 0)),   # conv2 im2col
            pl.BlockSpec(p["conv2_w"].shape, const2),
            pl.BlockSpec(p["conv2_b"].shape, const2),
            pl.BlockSpec(p["ln1"].shape, const2),
            pl.BlockSpec(p["wqkv"].shape, const3),
            pl.BlockSpec(p["bqkv"].shape, const3),
            pl.BlockSpec(p["wo"].shape, const2),
            pl.BlockSpec(p["bo"].shape, const2),
            pl.BlockSpec(p["ln2"].shape, const2),
            pl.BlockSpec(p["ffn_w1"].shape, const2),
            pl.BlockSpec(p["ffn_b1"].shape, const2),
            pl.BlockSpec(p["ffn_w2"].shape, const2),
            pl.BlockSpec(p["ffn_b2"].shape, const2),
            pl.BlockSpec(p["fuse_w"].shape, const2),
            pl.BlockSpec(p["fuse_b"].shape, const2),
            pl.BlockSpec(p["head_w1"].shape, const2),
            pl.BlockSpec(p["head_b1"].shape, const2),
            pl.BlockSpec(p["head_w2"].shape, const2),
            pl.BlockSpec(p["head_b2"].shape, const2),
            pl.BlockSpec(mupT.shape, const2),
        ],
        out_specs=pl.BlockSpec((1, NCLS, H * W), lambda b: (b, 0, 0)),
        compiler_params=pltpu.CompilerParams(dimension_semantics=("parallel",)),
    )(cols2, p["conv2_w"], p["conv2_b"], p["ln1"], p["wqkv"], p["bqkv"],
      p["wo"], p["bo"], p["ln2"], p["ffn_w1"], p["ffn_b1"], p["ffn_w2"],
      p["ffn_b2"], p["fuse_w"], p["fuse_b"], p["head_w1"], p["head_b1"],
      p["head_w2"], p["head_b2"], mupT)

    return out.reshape(N, NCLS, H, W)                             # NCHW


# -----------------------------------------------------------------------------
if __name__ == "__main__":
    key = jax.random.PRNGKey(0)
    kx, kp = jax.random.split(key)
    x = jax.random.normal(kx, (2, C_IN, 16, 16), jnp.float32)     # NCHW
    params = init_params(kp)

    fwd = jax.jit(mobilevit_deeplabv3_forward)
    out = fwd(params, x)
    out = jax.block_until_ready(out)

    assert out.shape == (2, NCLS, 16, 16), out.shape
    assert bool(jnp.all(jnp.isfinite(out)))
    # sigmoid followed by a convex bilinear blend stays in [0, 1]
    assert bool(jnp.all((out >= 0.0) & (out <= 1.0)))
    print("KERNEL_OK")
</pallas_src>

<mosaic_0001>
module attributes {stable_mosaic.version = 11 : i64} {
  func.func @_mm_bias_act_kernel(%arg0: i32, %arg1: memref<128x64xf32, #tpu.memory_space<vmem>>, %arg2: memref<64x16xf32, #tpu.memory_space<vmem>>, %arg3: memref<1x16xf32, #tpu.memory_space<vmem>>, %arg4: memref<128x16xf32, #tpu.memory_space<vmem>>) attributes {dimension_semantics = [#tpu.dimension_semantics<parallel>], iteration_bounds = array<i64: 1>, scalar_prefetch = 0 : i64, scratch_operands = 0 : i64, tpu.core_type = #tpu.core_type<tc>, window_params = [{transform_indices = @transform_0, window_bounds = array<i64: 128, 64>}, {pipeline_mode = #tpu.pipeline_mode<synchronous>, transform_indices = @transform_1, window_bounds = array<i64: 64, 16>}, {pipeline_mode = #tpu.pipeline_mode<synchronous>, transform_indices = @transform_2, window_bounds = array<i64: 1, 16>}, {transform_indices = @transform_3, window_bounds = array<i64: 128, 16>}]} {
    %c0 = arith.constant 0 : index
    %c0_0 = arith.constant 0 : index
    %0 = vector.load %arg1[%c0, %c0_0] : memref<128x64xf32, #tpu.memory_space<vmem>>, vector<128x64xf32>
    %c0_1 = arith.constant 0 : index
    %c0_2 = arith.constant 0 : index
    %1 = vector.load %arg2[%c0_1, %c0_2] : memref<64x16xf32, #tpu.memory_space<vmem>>, vector<64x16xf32>
    %cst = arith.constant dense<0.000000e+00> : vector<128x16xf32>
    %2 = tpu.matmul %0, %1, %cst {dimension_numbers = #tpu.dot_dimension_numbers<[1], [0], [0], [1], [0, 0, 1, 1], [], []>} : vector<128x64xf32>, vector<64x16xf32>, vector<128x16xf32> -> vector<128x16xf32>
    %c0_3 = arith.constant 0 : index
    %c0_4 = arith.constant 0 : index
    %3 = vector.load %arg3[%c0_3, %c0_4] : memref<1x16xf32, #tpu.memory_space<vmem>>, vector<1x16xf32>
    %4 = vector.broadcast %3 : vector<1x16xf32> to vector<128x16xf32>
    %5 = arith.addf %2, %4 : vector<128x16xf32>
    %6 = arith.negf %5 : vector<128x16xf32>
    %7 = math.exp %6 : vector<128x16xf32>
    %cst_5 = arith.constant 1.000000e+00 : f32
    %8 = vector.broadcast %cst_5 : f32 to vector<128x16xf32>
    %9 = arith.addf %8, %7 : vector<128x16xf32>
    %10 = arith.divf %8, %9 : vector<128x16xf32>
    %11 = arith.mulf %5, %10 : vector<128x16xf32>
    %c0_6 = arith.constant 0 : index
    %c0_7 = arith.constant 0 : index
    %12 = vector.load %arg4[%c0_6, %c0_7] : memref<128x16xf32, #tpu.memory_space<vmem>>, vector<128x16xf32>
    tpu.vector_store %arg4[%c0_6, %c0_7], %11 {strides = array<i32>} : memref<128x16xf32, #tpu.memory_space<vmem>>, vector<128x16xf32>,
    return
  }
  func.func @transform_0(%arg0: i32) -> (i32, i32) {
    %c0_i32 = arith.constant 0 : i32
    %c0_i32_0 = arith.constant 0 : i32
    return %arg0, %c0_i32 : i32, i32
  }
  func.func @transform_1(%arg0: i32) -> (i32, i32) {
    %c0_i32 = arith.constant 0 : i32
    %c0_i32_0 = arith.constant 0 : i32
    %c0_i32_1 = arith.constant 0 : i32
    return %c0_i32, %c0_i32_0 : i32, i32
  }
  func.func @transform_2(%arg0: i32) -> (i32, i32) {
    %c0_i32 = arith.constant 0 : i32
    %c0_i32_0 = arith.constant 0 : i32
    %c0_i32_1 = arith.constant 0 : i32
    return %c0_i32, %c0_i32_0 : i32, i32
  }
  func.func @transform_3(%arg0: i32) -> (i32, i32) {
    %c0_i32 = arith.constant 0 : i32
    %c0_i32_0 = arith.constant 0 : i32
    return %arg0, %c0_i32 : i32, i32
  }
}

module attributes {stable_mosaic.version = 11 : i64} {
  func.func @_mobilevit_seg_kernel(%arg0: i32, %arg1: memref<1x16x256xf32, #tpu.memory_space<vmem>>, %arg2: memref<256x32xf32, #tpu.memory_space<vmem>>, %arg3: memref<1x32xf32, #tpu.memory_space<vmem>>, %arg4: memref<2x32xf32, #tpu.memory_space<vmem>>, %arg5: memref<3x32x32xf32, #tpu.memory_space<vmem>>, %arg6: memref<3x1x32xf32, #tpu.memory_space<vmem>>, %arg7: memref<32x32xf32, #tpu.memory_space<vmem>>, %arg8: memref<1x32xf32, #tpu.memory_space<vmem>>, %arg9: memref<2x32xf32, #tpu.memory_space<vmem>>, %arg10: memref<32x64xf32, #tpu.memory_space<vmem>>, %arg11: memref<1x64xf32, #tpu.memory_space<vmem>>, %arg12: memref<64x32xf32, #tpu.memory_space<vmem>>, %arg13: memref<1x32xf32, #tpu.memory_space<vmem>>, %arg14: memref<32x32xf32, #tpu.memory_space<vmem>>, %arg15: memref<1x32xf32, #tpu.memory_space<vmem>>, %arg16: memref<32x32xf32, #tpu.memory_space<vmem>>, %arg17: memref<1x32xf32, #tpu.memory_space<vmem>>, %arg18: memref<1x32xf32, #tpu.memory_space<vmem>>, %arg19: memref<1x1xf32, #tpu.memory_space<vmem>>, %arg20: memref<16x256xf32, #tpu.memory_space<vmem>>, %arg21: memref<1x1x256xf32, #tpu.memory_space<vmem>>) attributes {dimension_semantics = [#tpu.dimension_semantics<parallel>], iteration_bounds = array<i64: 2>, scalar_prefetch = 0 : i64, scratch_operands = 0 : i64, tpu.core_type = #tpu.core_type<tc>, window_params = [{transform_indices = @transform_0, window_bounds = array<i64: 1, 16, 256>}, {pipeline_mode = #tpu.pipeline_mode<synchronous>, transform_indices = @transform_1, window_bounds = array<i64: 256, 32>}, {pipeline_mode = #tpu.pipeline_mode<synchronous>, transform_indices = @transform_2, window_bounds = array<i64: 1, 32>}, {pipeline_mode = #tpu.pipeline_mode<synchronous>, transform_indices = @transform_3, window_bounds = array<i64: 2, 32>}, {pipeline_mode = #tpu.pipeline_mode<synchronous>, transform_indices = @transform_4, window_bounds = array<i64: 3, 32, 32>}, {pipeline_mode = #tpu.pipeline_mode<synchronous>, transform_indices = @transform_5, window_bounds = array<i64: 3, 1, 32>}, {pipeline_mode = #tpu.pipeline_mode<synchronous>, transform_indices = @transform_6, window_bounds = array<i64: 32, 32>}, {pipeline_mode = #tpu.pipeline_mode<synchronous>, transform_indices = @transform_7, window_bounds = array<i64: 1, 32>}, {pipeline_mode = #tpu.pipeline_mode<synchronous>, transform_indices = @transform_8, window_bounds = array<i64: 2, 32>}, {pipeline_mode = #tpu.pipeline_mode<synchronous>, transform_indices = @transform_9, window_bounds = array<i64: 32, 64>}, {pipeline_mode = #tpu.pipeline_mode<synchronous>, transform_indices = @transform_10, window_bounds = array<i64: 1, 64>}, {pipeline_mode = #tpu.pipeline_mode<synchronous>, transform_indices = @transform_11, window_bounds = array<i64: 64, 32>}, {pipeline_mode = #tpu.pipeline_mode<synchronous>, transform_indices = @transform_12, window_bounds = array<i64: 1, 32>}, {pipeline_mode = #tpu.pipeline_mode<synchronous>, transform_indices = @transform_13, window_bounds = array<i64: 32, 32>}, {pipeline_mode = #tpu.pipeline_mode<synchronous>, transform_indices = @transform_14, window_bounds = array<i64: 1, 32>}, {pipeline_mode = #tpu.pipeline_mode<synchronous>, transform_indices = @transform_15, window_bounds = array<i64: 32, 32>}, {pipeline_mode = #tpu.pipeline_mode<synchronous>, transform_indices = @transform_16, window_bounds = array<i64: 1, 32>}, {pipeline_mode = #tpu.pipeline_mode<synchronous>, transform_indices = @transform_17, window_bounds = array<i64: 1, 32>}, {pipeline_mode = #tpu.pipeline_mode<synchronous>, transform_indices = @transform_18, window_bounds = array<i64: 1, 1>}, {pipeline_mode = #tpu.pipeline_mode<synchronous>, transform_indices = @transform_19, window_bounds = array<i64: 16, 256>}, {transform_indices = @transform_20, window_bounds = array<i64: 1, 1, 256>}]} {
    %c0 = arith.constant 0 : index
    %c0_0 = arith.constant 0 : index
    %c0_1 = arith.constant 0 : index
    %0 = vector.load %arg1[%c0, %c0_0, %c0_1] : memref<1x16x256xf32, #tpu.memory_space<vmem>>, vector<1x16x256xf32>
    %1 = vector.shape_cast %0 : vector<1x16x256xf32> to vector<16x256xf32>
    %c0_2 = arith.constant 0 : index
    %c0_3 = arith.constant 0 : index
    %2 = vector.load %arg2[%c0_2, %c0_3] : memref<256x32xf32, #tpu.memory_space<vmem>>, vector<256x32xf32>
    %c0_4 = arith.constant 0 : index
    %c0_5 = arith.constant 0 : index
    %3 = vector.load %arg3[%c0_4, %c0_5] : memref<1x32xf32, #tpu.memory_space<vmem>>, vector<1x32xf32>
    %cst = arith.constant dense<0.000000e+00> : vector<16x32xf32>
    %4 = tpu.matmul %1, %2, %cst {dimension_numbers = #tpu.dot_dimension_numbers<[1], [0], [0], [1], [0, 0, 1, 1], [], []>} : vector<16x256xf32>, vector<256x32xf32>, vector<16x32xf32> -> vector<16x32xf32>
    %5 = vector.broadcast %3 : vector<1x32xf32> to vector<16x32xf32>
    %6 = arith.addf %4, %5 : vector<16x32xf32>
    %7 = arith.negf %6 : vector<16x32xf32>
    %8 = math.exp %7 : vector<16x32xf32>
    %cst_6 = arith.constant 1.000000e+00 : f32
    %9 = vector.broadcast %cst_6 : f32 to vector<16x32xf32>
    %10 = arith.addf %9, %8 : vector<16x32xf32>
    %11 = arith.divf %9, %10 : vector<16x32xf32>
    %12 = arith.mulf %6, %11 : vector<16x32xf32>
    %c0_7 = arith.constant 0 : index
    %c0_8 = arith.constant 0 : index
    %13 = vector.load %arg4[%c0_7, %c0_8] : memref<2x32xf32, #tpu.memory_space<vmem>>, vector<2x32xf32>
    %cst_9 = arith.constant dense<0.000000e+00> : vector<16xf32>
    %14 = vector.multi_reduction <add>, %12, %cst_9 [1] : vector<16x32xf32> to vector<16xf32>
    %15 = vector.shape_cast %14 : vector<16xf32> to vector<16x1xf32>
    %cst_10 = arith.constant 3.200000e+01 : f32
    %16 = vector.broadcast %cst_10 : f32 to vector<16x1xf32>
    %17 = arith.divf %15, %16 : vector<16x1xf32>
    %18 = vector.broadcast %17 : vector<16x1xf32> to vector<16x32xf32>
    %19 = arith.subf %12, %18 : vector<16x32xf32>
    %20 = arith.mulf %19, %19 : vector<16x32xf32>
    %cst_11 = arith.constant dense<0.000000e+00> : vector<16xf32>
    %21 = vector.multi_reduction <add>, %20, %cst_11 [1] : vector<16x32xf32> to vector<16xf32>
    %22 = vector.shape_cast %21 : vector<16xf32> to vector<16x1xf32>
    %cst_12 = arith.constant 3.200000e+01 : f32
    %23 = vector.broadcast %cst_12 : f32 to vector<16x1xf32>
    %24 = arith.divf %22, %23 : vector<16x1xf32>
    %25 = vector.broadcast %17 : vector<16x1xf32> to vector<16x32xf32>
    %26 = arith.subf %12, %25 : vector<16x32xf32>
    %cst_13 = arith.constant 9.99999974E-6 : f32
    %27 = vector.broadcast %cst_13 : f32 to vector<16x1xf32>
    %28 = arith.addf %24, %27 : vector<16x1xf32>
    %29 = math.rsqrt %28 : vector<16x1xf32>
    %30 = vector.broadcast %29 : vector<16x1xf32> to vector<16x32xf32>
    %31 = arith.mulf %26, %30 : vector<16x32xf32>
    %32 = vector.extract_strided_slice %13 {offsets = [0, 0], sizes = [1, 32], strides = [1, 1]} : vector<2x32xf32> to vector<1x32xf32>
    %33 = vector.broadcast %32 : vector<1x32xf32> to vector<16x32xf32>
    %34 = arith.mulf %31, %33 : vector<16x32xf32>
    %35 = vector.extract_strided_slice %13 {offsets = [1, 0], sizes = [1, 32], strides = [1, 1]} : vector<2x32xf32> to vector<1x32xf32>
    %36 = vector.broadcast %35 : vector<1x32xf32> to vector<16x32xf32>
    %37 = arith.addf %34, %36 : vector<16x32xf32>
    %c0_14 = arith.constant 0 : index
    %c0_15 = arith.constant 0 : index
    %c0_16 = arith.constant 0 : index
    %38 = vector.load %arg5[%c0_14, %c0_15, %c0_16] : memref<3x32x32xf32, #tpu.memory_space<vmem>>, vector<1x32x32xf32>
    %39 = vector.shape_cast %38 : vector<1x32x32xf32> to vector<32x32xf32>
    %c0_17 = arith.constant 0 : index
    %c0_18 = arith.constant 0 : index
    %c0_19 = arith.constant 0 : index
    %40 = vector.load %arg6[%c0_17, %c0_18, %c0_19] : memref<3x1x32xf32, #tpu.memory_space<vmem>>, vector<1x1x32xf32>
    %41 = vector.shape_cast %40 : vector<1x1x32xf32> to vector<1x32xf32>
    %cst_20 = arith.constant dense<0.000000e+00> : vector<16x32xf32>
    %42 = tpu.matmul %37, %39, %cst_20 {dimension_numbers = #tpu.dot_dimension_numbers<[1], [0], [0], [1], [0, 0, 1, 1], [], []>} : vector<16x32xf32>, vector<32x32xf32>, vector<16x32xf32> -> vector<16x32xf32>
    %43 = vector.broadcast %41 : vector<1x32xf32> to vector<16x32xf32>
    %44 = arith.addf %42, %43 : vector<16x32xf32>
    %c1 = arith.constant 1 : index
    %c0_21 = arith.constant 0 : index
    %c0_22 = arith.constant 0 : index
    %45 = vector.load %arg5[%c1, %c0_21, %c0_22] : memref<3x32x32xf32, #tpu.memory_space<vmem>>, vector<1x32x32xf32>
    %46 = vector.shape_cast %45 : vector<1x32x32xf32> to vector<32x32xf32>
    %c1_23 = arith.constant 1 : index
    %c0_24 = arith.constant 0 : index
    %c0_25 = arith.constant 0 : index
    %47 = vector.load %arg6[%c1_23, %c0_24, %c0_25] : memref<3x1x32xf32, #tpu.memory_space<vmem>>, vector<1x1x32xf32>
    %48 = vector.shape_cast %47 : vector<1x1x32xf32> to vector<1x32xf32>
    %cst_26 = arith.constant dense<0.000000e+00> : vector<16x32xf32>
    %49 = tpu.matmul %37, %46, %cst_26 {dimension_numbers = #tpu.dot_dimension_numbers<[1], [0], [0], [1], [0, 0, 1, 1], [], []>} : vector<16x32xf32>, vector<32x32xf32>, vector<16x32xf32> -> vector<16x32xf32>
    %50 = vector.broadcast %48 : vector<1x32xf32> to vector<16x32xf32>
    %51 = arith.addf %49, %50 : vector<16x32xf32>
    %c2 = arith.constant 2 : index
    %c0_27 = arith.constant 0 : index
    %c0_28 = arith.constant 0 : index
    %52 = vector.load %arg5[%c2, %c0_27, %c0_28] : memref<3x32x32xf32, #tpu.memory_space<vmem>>, vector<1x32x32xf32>
    %53 = vector.shape_cast %52 : vector<1x32x32xf32> to vector<32x32xf32>
    %c2_29 = arith.constant 2 : index
    %c0_30 = arith.constant 0 : index
    %c0_31 = arith.constant 0 : index
    %54 = vector.load %arg6[%c2_29, %c0_30, %c0_31] : memref<3x1x32xf32, #tpu.memory_space<vmem>>, vector<1x1x32xf32>
    %55 = vector.shape_cast %54 : vector<1x1x32xf32> to vector<1x32xf32>
    %cst_32 = arith.constant dense<0.000000e+00> : vector<16x32xf32>
    %56 = tpu.matmul %37, %53, %cst_32 {dimension_numbers = #tpu.dot_dimension_numbers<[1], [0], [0], [1], [0, 0, 1, 1], [], []>} : vector<16x32xf32>, vector<32x32xf32>, vector<16x32xf32> -> vector<16x32xf32>
    %57 = vector.broadcast %55 : vector<1x32xf32> to vector<16x32xf32>
    %58 = arith.addf %56, %57 : vector<16x32xf32>
    %59 = tpu.transpose %51, [1, 0] : vector<16x32xf32> -> vector<32x16xf32>
    %cst_33 = arith.constant dense<0.000000e+00> : vector<16x16xf32>
    %60 = tpu.matmul %44, %59, %cst_33 {dimension_numbers = #tpu.dot_dimension_numbers<[1], [0], [0], [1], [0, 0, 1, 1], [], []>} : vector<16x32xf32>, vector<32x16xf32>, vector<16x16xf32> -> vector<16x16xf32>
    %cst_34 = arith.constant 0.176776692 : f32
    %61 = vector.broadcast %cst_34 : f32 to vector<16x16xf32>
    %62 = arith.mulf %60, %61 : vector<16x16xf32>
    %cst_35 = arith.constant dense<0xFF800000> : vector<16xf32>
    %63 = vector.multi_reduction <maximumf>, %62, %cst_35 [1] : vector<16x16xf32> to vector<16xf32>
    %64 = vector.shape_cast %63 : vector<16xf32> to vector<16x1xf32>
    %65 = vector.broadcast %64 : vector<16x1xf32> to vector<16x16xf32>
    %66 = arith.subf %62, %65 : vector<16x16xf32>
    %67 = math.exp %66 : vector<16x16xf32>
    %cst_36 = arith.constant dense<0.000000e+00> : vector<16xf32>
    %68 = vector.multi_reduction <add>, %67, %cst_36 [1] : vector<16x16xf32> to vector<16xf32>
    %69 = vector.shape_cast %68 : vector<16xf32> to vector<16x1xf32>
    %70 = vector.broadcast %69 : vector<16x1xf32> to vector<16x16xf32>
    %71 = arith.divf %67, %70 : vector<16x16xf32>
    %cst_37 = arith.constant dense<0.000000e+00> : vector<16x32xf32>
    %72 = tpu.matmul %71, %58, %cst_37 {dimension_numbers = #tpu.dot_dimension_numbers<[1], [0], [0], [1], [0, 0, 1, 1], [], []>} : vector<16x16xf32>, vector<16x32xf32>, vector<16x32xf32> -> vector<16x32xf32>
    %c0_38 = arith.constant 0 : index
    %c0_39 = arith.constant 0 : index
    %73 = vector.load %arg7[%c0_38, %c0_39] : memref<32x32xf32, #tpu.memory_space<vmem>>, vector<32x32xf32>
    %c0_40 = arith.constant 0 : index
    %c0_41 = arith.constant 0 : index
    %74 = vector.load %arg8[%c0_40, %c0_41] : memref<1x32xf32, #tpu.memory_space<vmem>>, vector<1x32xf32>
    %cst_42 = arith.constant dense<0.000000e+00> : vector<16x32xf32>
    %75 = tpu.matmul %72, %73, %cst_42 {dimension_numbers = #tpu.dot_dimension_numbers<[1], [0], [0], [1], [0, 0, 1, 1], [], []>} : vector<16x32xf32>, vector<32x32xf32>, vector<16x32xf32> -> vector<16x32xf32>
    %76 = vector.broadcast %74 : vector<1x32xf32> to vector<16x32xf32>
    %77 = arith.addf %75, %76 : vector<16x32xf32>
    %78 = arith.addf %12, %77 : vector<16x32xf32>
    %c0_43 = arith.constant 0 : index
    %c0_44 = arith.constant 0 : index
    %79 = vector.load %arg9[%c0_43, %c0_44] : memref<2x32xf32, #tpu.memory_space<vmem>>, vector<2x32xf32>
    %cst_45 = arith.constant dense<0.000000e+00> : vector<16xf32>
    %80 = vector.multi_reduction <add>, %78, %cst_45 [1] : vector<16x32xf32> to vector<16xf32>
    %81 = vector.shape_cast %80 : vector<16xf32> to vector<16x1xf32>
    %cst_46 = arith.constant 3.200000e+01 : f32
    %82 = vector.broadcast %cst_46 : f32 to vector<16x1xf32>
    %83 = arith.divf %81, %82 : vector<16x1xf32>
    %84 = vector.broadcast %83 : vector<16x1xf32> to vector<16x32xf32>
    %85 = arith.subf %78, %84 : vector<16x32xf32>
    %86 = arith.mulf %85, %85 : vector<16x32xf32>
    %cst_47 = arith.constant dense<0.000000e+00> : vector<16xf32>
    %87 = vector.multi_reduction <add>, %86, %cst_47 [1] : vector<16x32xf32> to vector<16xf32>
    %88 = vector.shape_cast %87 : vector<16xf32> to vector<16x1xf32>
    %cst_48 = arith.constant 3.200000e+01 : f32
    %89 = vector.broadcast %cst_48 : f32 to vector<16x1xf32>
    %90 = arith.divf %88, %89 : vector<16x1xf32>
    %91 = vector.broadcast %83 : vector<16x1xf32> to vector<16x32xf32>
    %92 = arith.subf %78, %91 : vector<16x32xf32>
    %cst_49 = arith.constant 9.99999974E-6 : f32
    %93 = vector.broadcast %cst_49 : f32 to vector<16x1xf32>
    %94 = arith.addf %90, %93 : vector<16x1xf32>
    %95 = math.rsqrt %94 : vector<16x1xf32>
    %96 = vector.broadcast %95 : vector<16x1xf32> to vector<16x32xf32>
    %97 = arith.mulf %92, %96 : vector<16x32xf32>
    %98 = vector.extract_strided_slice %79 {offsets = [0, 0], sizes = [1, 32], strides = [1, 1]} : vector<2x32xf32> to vector<1x32xf32>
    %99 = vector.broadcast %98 : vector<1x32xf32> to vector<16x32xf32>
    %100 = arith.mulf %97, %99 : vector<16x32xf32>
    %101 = vector.extract_strided_slice %79 {offsets = [1, 0], sizes = [1, 32], strides = [1, 1]} : vector<2x32xf32> to vector<1x32xf32>
    %102 = vector.broadcast %101 : vector<1x32xf32> to vector<16x32xf32>
    %103 = arith.addf %100, %102 : vector<16x32xf32>
    %c0_50 = arith.constant 0 : index
    %c0_51 = arith.constant 0 : index
    %104 = vector.load %arg10[%c0_50, %c0_51] : memref<32x64xf32, #tpu.memory_space<vmem>>, vector<32x64xf32>
    %c0_52 = arith.constant 0 : index
    %c0_53 = arith.constant 0 : index
    %105 = vector.load %arg11[%c0_52, %c0_53] : memref<1x64xf32, #tpu.memory_space<vmem>>, vector<1x64xf32>
    %cst_54 = arith.constant dense<0.000000e+00> : vector<16x64xf32>
    %106 = tpu.matmul %103, %104, %cst_54 {dimension_numbers = #tpu.dot_dimension_numbers<[1], [0], [0], [1], [0, 0, 1, 1], [], []>} : vector<16x32xf32>, vector<32x64xf32>, vector<16x64xf32> -> vector<16x64xf32>
    %107 = vector.broadcast %105 : vector<1x64xf32> to vector<16x64xf32>
    %108 = arith.addf %106, %107 : vector<16x64xf32>
    %109 = arith.negf %108 : vector<16x64xf32>
    %110 = math.exp %109 : vector<16x64xf32>
    %cst_55 = arith.constant 1.000000e+00 : f32
    %111 = vector.broadcast %cst_55 : f32 to vector<16x64xf32>
    %112 = arith.addf %111, %110 : vector<16x64xf32>
    %113 = arith.divf %111, %112 : vector<16x64xf32>
    %114 = arith.mulf %108, %113 : vector<16x64xf32>
    %c0_56 = arith.constant 0 : index
    %c0_57 = arith.constant 0 : index
    %115 = vector.load %arg12[%c0_56, %c0_57] : memref<64x32xf32, #tpu.memory_space<vmem>>, vector<64x32xf32>
    %c0_58 = arith.constant 0 : index
    %c0_59 = arith.constant 0 : index
    %116 = vector.load %arg13[%c0_58, %c0_59] : memref<1x32xf32, #tpu.memory_space<vmem>>, vector<1x32xf32>
    %cst_60 = arith.constant dense<0.000000e+00> : vector<16x32xf32>
    %117 = tpu.matmul %114, %115, %cst_60 {dimension_numbers = #tpu.dot_dimension_numbers<[1], [0], [0], [1], [0, 0, 1, 1], [], []>} : vector<16x64xf32>, vector<64x32xf32>, vector<16x32xf32> -> vector<16x32xf32>
    %118 = vector.broadcast %116 : vector<1x32xf32> to vector<16x32xf32>
    %119 = arith.addf %117, %118 : vector<16x32xf32>
    %120 = arith.addf %78, %119 : vector<16x32xf32>
    %c0_61 = arith.constant 0 : index
    %c0_62 = arith.constant 0 : index
    %121 = vector.load %arg14[%c0_61, %c0_62] : memref<32x32xf32, #tpu.memory_space<vmem>>, vector<32x32xf32>
    %c0_63 = arith.constant 0 : index
    %c0_64 = arith.constant 0 : index
    %122 = vector.load %arg15[%c0_63, %c0_64] : memref<1x32xf32, #tpu.memory_space<vmem>>, vector<1x32xf32>
    %cst_65 = arith.constant dense<0.000000e+00> : vector<16x32xf32>
    %123 = tpu.matmul %120, %121, %cst_65 {dimension_numbers = #tpu.dot_dimension_numbers<[1], [0], [0], [1], [0, 0, 1, 1], [], []>} : vector<16x32xf32>, vector<32x32xf32>, vector<16x32xf32> -> vector<16x32xf32>
    %124 = vector.broadcast %122 : vector<1x32xf32> to vector<16x32xf32>
    %125 = arith.addf %123, %124 : vector<16x32xf32>
    %126 = arith.negf %125 : vector<16x32xf32>
    %127 = math.exp %126 : vector<16x32xf32>
    %cst_66 = arith.constant 1.000000e+00 : f32
    %128 = vector.broadcast %cst_66 : f32 to vector<16x32xf32>
    %129 = arith.addf %128, %127 : vector<16x32xf32>
    %130 = arith.divf %128, %129 : vector<16x32xf32>
    %131 = arith.mulf %125, %130 : vector<16x32xf32>
    %c0_67 = arith.constant 0 : index
    %c0_68 = arith.constant 0 : index
    %132 = vector.load %arg16[%c0_67, %c0_68] : memref<32x32xf32, #tpu.memory_space<vmem>>, vector<32x32xf32>
    %c0_69 = arith.constant 0 : index
    %c0_70 = arith.constant 0 : index
    %133 = vector.load %arg17[%c0_69, %c0_70] : memref<1x32xf32, #tpu.memory_space<vmem>>, vector<1x32xf32>
    %cst_71 = arith.constant dense<0.000000e+00> : vector<16x32xf32>
    %134 = tpu.matmul %131, %132, %cst_71 {dimension_numbers = #tpu.dot_dimension_numbers<[1], [0], [0], [1], [0, 0, 1, 1], [], []>} : vector<16x32xf32>, vector<32x32xf32>, vector<16x32xf32> -> vector<16x32xf32>
    %135 = vector.broadcast %133 : vector<1x32xf32> to vector<16x32xf32>
    %136 = arith.addf %134, %135 : vector<16x32xf32>
    %cst_72 = arith.constant 0.000000e+00 : f32
    %137 = vector.broadcast %cst_72 : f32 to vector<16x32xf32>
    %138 = arith.maximumf %136, %137 : vector<16x32xf32>
    %c0_73 = arith.constant 0 : index
    %c0_74 = arith.constant 0 : index
    %139 = vector.load %arg18[%c0_73, %c0_74] : memref<1x32xf32, #tpu.memory_space<vmem>>, vector<1x32xf32>
    %140 = vector.broadcast %139 : vector<1x32xf32> to vector<16x32xf32>
    %141 = arith.mulf %138, %140 : vector<16x32xf32>
    %cst_75 = arith.constant dense<0.000000e+00> : vector<16xf32>
    %142 = vector.multi_reduction <add>, %141, %cst_75 [1] : vector<16x32xf32> to vector<16xf32>
    %143 = vector.shape_cast %142 : vector<16xf32> to vector<16x1xf32>
    %c0_76 = arith.constant 0 : index
    %c0_77 = arith.constant 0 : index
    %144 = vector.load %arg19[%c0_76, %c0_77] : memref<1x1xf32, #tpu.memory_space<vmem>>, vector<1x1xf32>
    %145 = vector.broadcast %144 : vector<1x1xf32> to vector<16x1xf32>
    %146 = arith.addf %143, %145 : vector<16x1xf32>
    %147 = arith.negf %146 : vector<16x1xf32>
    %148 = math.exp %147 : vector<16x1xf32>
    %cst_78 = arith.constant 1.000000e+00 : f32
    %149 = vector.broadcast %cst_78 : f32 to vector<16x1xf32>
    %150 = arith.addf %149, %148 : vector<16x1xf32>
    %151 = arith.divf %149, %150 : vector<16x1xf32>
    %c0_79 = arith.constant 0 : index
    %c0_80 = arith.constant 0 : index
    %152 = vector.load %arg20[%c0_79, %c0_80] : memref<16x256xf32, #tpu.memory_space<vmem>>, vector<16x256xf32>
    %153 = vector.broadcast %151 : vector<16x1xf32> to vector<16x256xf32>
    %154 = arith.mulf %152, %153 : vector<16x256xf32>
    %cst_81 = arith.constant dense<0.000000e+00> : vector<256xf32>
    %155 = vector.multi_reduction <add>, %154, %cst_81 [0] : vector<16x256xf32> to vector<256xf32>
    %156 = vector.shape_cast %155 : vector<256xf32> to vector<1x256xf32>
    %c0_82 = arith.constant 0 : index
    %c0_83 = arith.constant 0 : index
    %c0_84 = arith.constant 0 : index
    %157 = vector.load %arg21[%c0_82, %c0_83, %c0_84] : memref<1x1x256xf32, #tpu.memory_space<vmem>>, vector<1x1x256xf32>
    %158 = vector.shape_cast %157 : vector<1x1x256xf32> to vector<1x256xf32>
    %159 = vector.shape_cast %156 : vector<1x256xf32> to vector<1x1x256xf32>
    tpu.vector_store %arg21[%c0_82, %c0_83, %c0_84], %159 {strides = array<i32>} : memref<1x1x256xf32, #tpu.memory_space<vmem>>, vector<1x1x256xf32>,
    return
  }
  func.func @transform_0(%arg0: i32) -> (i32, i32, i32) {
    %c0_i32 = arith.constant 0 : i32
    %c0_i32_0 = arith.constant 0 : i32
    %c0_i32_1 = arith.constant 0 : i32
    return %arg0, %c0_i32, %c0_i32_0 : i32, i32, i32
  }
  func.func @transform_1(%arg0: i32) -> (i32, i32) {
    %c0_i32 = arith.constant 0 : i32
    %c0_i32_0 = arith.constant 0 : i32
    %c0_i32_1 = arith.constant 0 : i32
    return %c0_i32, %c0_i32_0 : i32, i32
  }
  func.func @transform_2(%arg0: i32) -> (i32, i32) {
    %c0_i32 = arith.constant 0 : i32
    %c0_i32_0 = arith.constant 0 : i32
    %c0_i32_1 = arith.constant 0 : i32
    return %c0_i32, %c0_i32_0 : i32, i32
  }
  func.func @transform_3(%arg0: i32) -> (i32, i32) {
    %c0_i32 = arith.constant 0 : i32
    %c0_i32_0 = arith.constant 0 : i32
    %c0_i32_1 = arith.constant 0 : i32
    return %c0_i32, %c0_i32_0 : i32, i32
  }
  func.func @transform_4(%arg0: i32) -> (i32, i32, i32) {
    %c0_i32 = arith.constant 0 : i32
    %c0_i32_0 = arith.constant 0 : i32
    %c0_i32_1 = arith.constant 0 : i32
    %c0_i32_2 = arith.constant 0 : i32
    return %c0_i32, %c0_i32_0, %c0_i32_1 : i32, i32, i32
  }
  func.func @transform_5(%arg0: i32) -> (i32, i32, i32) {
    %c0_i32 = arith.constant 0 : i32
    %c0_i32_0 = arith.constant 0 : i32
    %c0_i32_1 = arith.constant 0 : i32
    %c0_i32_2 = arith.constant 0 : i32
    return %c0_i32, %c0_i32_0, %c0_i32_1 : i32, i32, i32
  }
  func.func @transform_6(%arg0: i32) -> (i32, i32) {
    %c0_i32 = arith.constant 0 : i32
    %c0_i32_0 = arith.constant 0 : i32
    %c0_i32_1 = arith.constant 0 : i32
    return %c0_i32, %c0_i32_0 : i32, i32
  }
  func.func @transform_7(%arg0: i32) -> (i32, i32) {
    %c0_i32 = arith.constant 0 : i32
    %c0_i32_0 = arith.constant 0 : i32
    %c0_i32_1 = arith.constant 0 : i32
    return %c0_i32, %c0_i32_0 : i32, i32
  }
  func.func @transform_8(%arg0: i32) -> (i32, i32) {
    %c0_i32 = arith.constant 0 : i32
    %c0_i32_0 = arith.constant 0 : i32
    %c0_i32_1 = arith.constant 0 : i32
    return %c0_i32, %c0_i32_0 : i32, i32
  }
  func.func @transform_9(%arg0: i32) -> (i32, i32) {
    %c0_i32 = arith.constant 0 : i32
    %c0_i32_0 = arith.constant 0 : i32
    %c0_i32_1 = arith.constant 0 : i32
    return %c0_i32, %c0_i32_0 : i32, i32
  }
  func.func @transform_10(%arg0: i32) -> (i32, i32) {
    %c0_i32 = arith.constant 0 : i32
    %c0_i32_0 = arith.constant 0 : i32
    %c0_i32_1 = arith.constant 0 : i32
    return %c0_i32, %c0_i32_0 : i32, i32
  }
  func.func @transform_11(%arg0: i32) -> (i32, i32) {
    %c0_i32 = arith.constant 0 : i32
    %c0_i32_0 = arith.constant 0 : i32
    %c0_i32_1 = arith.constant 0 : i32
    return %c0_i32, %c0_i32_0 : i32, i32
  }
  func.func @transform_12(%arg0: i32) -> (i32, i32) {
    %c0_i32 = arith.constant 0 : i32
    %c0_i32_0 = arith.constant 0 : i32
    %c0_i32_1 = arith.constant 0 : i32
    return %c0_i32, %c0_i32_0 : i32, i32
  }
  func.func @transform_13(%arg0: i32) -> (i32, i32) {
    %c0_i32 = arith.constant 0 : i32
    %c0_i32_0 = arith.constant 0 : i32
    %c0_i32_1 = arith.constant 0 : i32
    return %c0_i32, %c0_i32_0 : i32, i32
  }
  func.func @transform_14(%arg0: i32) -> (i32, i32) {
    %c0_i32 = arith.constant 0 : i32
    %c0_i32_0 = arith.constant 0 : i32
    %c0_i32_1 = arith.constant 0 : i32
    return %c0_i32, %c0_i32_0 : i32, i32
  }
  func.func @transform_15(%arg0: i32) -> (i32, i32) {
    %c0_i32 = arith.constant 0 : i32
    %c0_i32_0 = arith.constant 0 : i32
    %c0_i32_1 = arith.constant 0 : i32
    return %c0_i32, %c0_i32_0 : i32, i32
  }
  func.func @transform_16(%arg0: i32) -> (i32, i32) {
    %c0_i32 = arith.constant 0 : i32
    %c0_i32_0 = arith.constant 0 : i32
    %c0_i32_1 = arith.constant 0 : i32
    return %c0_i32, %c0_i32_0 : i32, i32
  }
  func.func @transform_17(%arg0: i32) -> (i32, i32) {
    %c0_i32 = arith.constant 0 : i32
    %c0_i32_0 = arith.constant 0 : i32
    %c0_i32_1 = arith.constant 0 : i32
    return %c0_i32, %c0_i32_0 : i32, i32
  }
  func.func @transform_18(%arg0: i32) -> (i32, i32) {
    %c0_i32 = arith.constant 0 : i32
    %c0_i32_0 = arith.constant 0 : i32
    %c0_i32_1 = arith.constant 0 : i32
    return %c0_i32, %c0_i32_0 : i32, i32
  }
  func.func @transform_19(%arg0: i32) -> (i32, i32) {
    %c0_i32 = arith.constant 0 : i32
    %c0_i32_0 = arith.constant 0 : i32
    %c0_i32_1 = arith.constant 0 : i32
    return %c0_i32, %c0_i32_0 : i32, i32
  }
  func.func @transform_20(%arg0: i32) -> (i32, i32, i32) {
    %c0_i32 = arith.constant 0 : i32
    %c0_i32_0 = arith.constant 0 : i32
    %c0_i32_1 = arith.constant 0 : i32
    return %arg0, %c0_i32, %c0_i32_0 : i32, i32, i32
  }
}

</mosaic_0001>

<bundles_post_ra>
// kernel: mobilevit_deeplabv3_forward.2
= control target key start
LH: loop header
LB: loop body
LE: loop exit
PB: predicated region body
PF: predicated region fallthrough
CT: control target
= control target key end

     0   :  { %vm42_vm0 = vcmask 523264   ;;  %vm476_vm4 = vcmask 130048   ;;  %s1065_s1 = inlined_call_operand.vmem [shape: f32[64,16], index: 1, kind: input, shape index: {}]   ;;  %s1066_s2 = inlined_call_operand.vmem [shape: f32[1,16], index: 2, kind: input, shape index: {}]   ;;  %s1067_s0 = inlined_call_operand.vmem [shape: f32[128,64], index: 0, kind: input, shape index: {}]   ;;  %s1068_s3 = inlined_call_operand.vmem [shape: f32[128,16], index: 3, kind: output, shape index: {}]  }
   0x1   :  { %v37_v0 = vld [vmem:[%s1065_s1 + $0x38] sm:$0xff]  ;;  %v36_v1 = vld [vmem:[%s1065_s1 + $0x30] sm:$0xff]  ;;  %v35_v2 = vld [vmem:[%s1065_s1 + $0x28] sm:$0xff] }
   0x2   :  { %99 = vmatpush.msra.mxu0 %v37_v0  ;;  %529 = vmatpush.msra.mxu1 %v37_v0  ;;  %v34_v3 = vld [vmem:[%s1065_s1 + $0x20] sm:$0xff]  ;;  %v33_v4 = vld [vmem:[%s1065_s1 + $0x18] sm:$0xff]  ;;  %v32_v5 = vld [vmem:[%s1065_s1 + $0x10] sm:$0xff] }
   0x3   :  { %530 = vmatpush.msra.mxu2 %v37_v0  ;;  %531 = vmatpush.msra.mxu3 %v37_v0  ;;  %v31_v6 = vld [vmem:[%s1065_s1 + $0x8] sm:$0xff]  ;;  %v30_v7 = vld [vmem:[%s1065_s1] sm:$0xff]  ;;  %v16_v16 = vld [vmem:[%s1067_s0 + $0x10] sm:$0xff] }
   0x4   :  { %100 = vmatpush.msra.mxu0 %v36_v1  ;;  %532 = vmatpush.msra.mxu1 %v36_v1  ;;  %v14_v8 = vld [vmem:[%s1067_s0] sm:$0xff]  ;;  %v15_v12 = vld [vmem:[%s1067_s0 + $0x8] sm:$0xff]  ;;  %v20_v17 = vld [vmem:[%s1067_s0 + $0x30] sm:$0xff] }
   0x5   :  { %533 = vmatpush.msra.mxu2 %v36_v1  ;;  %534 = vmatpush.msra.mxu3 %v36_v1  ;;  %v18_v9 = vld [vmem:[%s1067_s0 + $0x20] sm:$0xff]  ;;  %v19_v13 = vld [vmem:[%s1067_s0 + $0x28] sm:$0xff]  ;;  %v24_v18 = vld [vmem:[%s1067_s0 + $0x50] sm:$0xff] }
   0x6   :  { %101 = vmatpush.msra.mxu0 %v35_v2  ;;  %535 = vmatpush.msra.mxu1 %v35_v2  ;;  %v22_v10 = vld [vmem:[%s1067_s0 + $0x40] sm:$0xff]  ;;  %v23_v14 = vld [vmem:[%s1067_s0 + $0x48] sm:$0xff]  ;;  %v28_v19 = vld [vmem:[%s1067_s0 + $0x70] sm:$0xff] }
   0x7   :  { %536 = vmatpush.msra.mxu2 %v35_v2  ;;  %537 = vmatpush.msra.mxu3 %v35_v2  ;;  %v26_v11 = vld [vmem:[%s1067_s0 + $0x60] sm:$0xff]  ;;  %v27_v15 = vld [vmem:[%s1067_s0 + $0x68] sm:$0xff]  ;;  %v17_v20 = vld [vmem:[%s1067_s0 + $0x18] sm:$0xff] }
   0x8   :  { %102 = vmatpush.msra.mxu0 %v34_v3  ;;  %538 = vmatpush.msra.mxu1 %v34_v3  ;;  %v21_v21 = vld [vmem:[%s1067_s0 + $0x38] sm:$0xff]  ;;  %v729_v24 = vld [vmem:[%s1066_s2] ss:$0 sm:$0xff] }
   0x9   :  { %539 = vmatpush.msra.mxu2 %v34_v3  ;;  %540 = vmatpush.msra.mxu3 %v34_v3  ;;  %v25_v22 = vld [vmem:[%s1067_s0 + $0x58] sm:$0xff] }
   0xa   :  { %103 = vmatpush.msra.mxu0 %v33_v4  ;;  %541 = vmatpush.msra.mxu1 %v33_v4  ;;  %v29_v23 = vld [vmem:[%s1067_s0 + $0x78] sm:$0xff] }
   0xb   :  { %542 = vmatpush.msra.mxu2 %v33_v4  ;;  %543 = vmatpush.msra.mxu3 %v33_v4 }
   0xc   :  { %104 = vmatpush.msra.mxu0 %v32_v5  ;;  %544 = vmatpush.msra.mxu1 %v32_v5 }
   0xd   :  { %545 = vmatpush.msra.mxu2 %v32_v5  ;;  %546 = vmatpush.msra.mxu3 %v32_v5 }
   0xe   :  { %105 = vmatpush.msra.mxu0 %v31_v6  ;;  %547 = vmatpush.msra.mxu1 %v31_v6 }
   0xf   :  { %548 = vmatpush.msra.mxu2 %v31_v6  ;;  %549 = vmatpush.msra.mxu3 %v31_v6 }
  0x10   :  { %106 = vmatpush.msra.mxu0 %v30_v7  ;;  %550 = vmatpush.msra.mxu1 %v30_v7 }
  0x11   :  { %551 = vmatpush.msra.mxu2 %v30_v7  ;;  %552 = vmatpush.msra.mxu3 %v30_v7 }
  0x12   :  { %497 = vmatmul.msk.f32.vlgmr.msra.gmra.mxu0 %vm42_vm0, %v14_v8  ;;  %501 = vmatmul.msk.f32.vlgmr.msra.gmra.mxu1 %vm42_vm0, %v18_v9 }
  0x13   :  { %505 = vmatmul.msk.f32.vlgmr.msra.gmra.mxu2 %vm42_vm0, %v22_v10  ;;  %509 = vmatmul.msk.f32.vlgmr.msra.gmra.mxu3 %vm42_vm0, %v26_v11 }
  0x1a   :  { %498 = vmatmul.msk.f32.gmra.mxu0 %vm42_vm0, %v15_v12  ;;  %502 = vmatmul.msk.f32.gmra.mxu1 %vm42_vm0, %v19_v13 }
  0x1b   :  { %506 = vmatmul.msk.f32.gmra.mxu2 %vm42_vm0, %v23_v14  ;;  %510 = vmatmul.msk.f32.gmra.mxu3 %vm42_vm0, %v27_v15 }
  0x22   :  { %499 = vmatmul.msk.f32.gmra.mxu0 %vm42_vm0, %v16_v16  ;;  %503 = vmatmul.msk.f32.gmra.mxu1 %vm42_vm0, %v20_v17 }
  0x23   :  { %507 = vmatmul.msk.f32.gmra.mxu2 %vm42_vm0, %v24_v18  ;;  %511 = vmatmul.msk.f32.gmra.mxu3 %vm42_vm0, %v28_v19 }
  0x2a   :  { %500 = vmatmul.msk.f32.gmra.mxu0 %vm42_vm0, %v17_v20  ;;  %504 = vmatmul.msk.f32.gmra.mxu1 %vm42_vm0, %v21_v21 }
  0x2b   :  { %508 = vmatmul.msk.f32.gmra.mxu2 %vm42_vm0, %v25_v22  ;;  %512 = vmatmul.msk.f32.gmra.mxu3 %vm42_vm0, %v29_v23 }
  0x8f   :  { %v108_v25 = vpop.f32.mrf.mxu0  ;;  %v120_v26 = vpop.f32.mrf.mxu1 }
  0x90   :  { %v732_v27 = vadd.f32 %v729_v24, %v108_v25  ;;  %v735_v28 = vadd.f32 %v729_v24, %v120_v26 }
  0x92   :  { %v513_v29 = vmul.f32 -1.442695, %v732_v27  ;;  %v517_v30 = vmul.f32 -1.442695, %v735_v28 }
  0x94   :  { %554 = vpow2.f32 %v513_v29 }
  0x95   :  { %556 = vpow2.f32 %v517_v30 }
  0x96   :  { %v132_v31 = vpop.f32.mrf.mxu2  ;;  %v144_v32 = vpop.f32.mrf.mxu3 }
  0x97   :  { %v740_v33 = vadd.f32 %v729_v24, %v132_v31  ;;  %v743_v34 = vadd.f32 %v729_v24, %v144_v32  ;;  %v111_v35 = vpop.f32.mrf.mxu0  ;;  %v123_v36 = vpop.f32.mrf.mxu1 }
  0x98   :  { %v746_v37 = vadd.f32 %v729_v24, %v111_v35  ;;  %v749_v38 = vadd.f32 %v729_v24, %v123_v36 }
  0x99   :  { %v521_v39 = vmul.f32 -1.442695, %v740_v33  ;;  %v525_v40 = vmul.f32 -1.442695, %v743_v34 }
  0x9a   :  { %v555_v41 = vpop.eup %554  ;;  %v514_v44 = vmul.f32 -1.442695, %v746_v37  ;;  %v518_v46 = vmul.f32 -1.442695, %v749_v38 }
  0x9b   :  { %v557_v42 = vpop.eup %556  ;;  %v753_v43 = vadd.f32 1.0, %v555_v41  ;;  %558 = vpow2.f32 %v521_v39 }
  0x9c   :  { %v756_v45 = vadd.f32 1.0, %v557_v42  ;;  %560 = vpow2.f32 %v525_v40 }
  0x9d   :  { %562 = vrcp.f32 %v753_v43  ;;  %v229_v51 = vand.u32 2147483647, %v753_v43  ;;  %v231_v52 = vand.u32 2147483648, %v753_v43  ;;  %vm225_vm1 = vweird.f32 %v753_v43 }
  0x9e   :  { %564 = vrcp.f32 %v756_v45  ;;  %v135_v47 = vpop.f32.mrf.mxu2  ;;  %v147_v48 = vpop.f32.mrf.mxu3  ;;  %v289_v54 = vand.u32 2147483647, %v756_v45  ;;  %v291_v55 = vand.u32 2147483648, %v756_v45  ;;  %vm285_vm2 = vweird.f32 %v756_v45 }
  0x9f   :  { %566 = vpow2.f32 %v514_v44  ;;  %v762_v49 = vadd.f32 %v729_v24, %v135_v47  ;;  %v114_v50 = vpop.f32.mrf.mxu0  ;;  %v770_v57 = vadd.f32 %v729_v24, %v147_v48  ;;  %v126_v63 = vpop.f32.mrf.mxu1  ;;  %vm782_vm3 = vcmp.eq.f32.partialorder %v229_v51, 8.507059e+37 }
  0xa0   :  { %568 = vpow2.f32 %v518_v46  ;;  %v775_v60 = vadd.f32 %v729_v24, %v114_v50  ;;  %v232_v3 = vor.u32 1.1754944e-38, %v231_v52  ;;  %vm788_vm5 = vcmp.eq.f32.partialorder %v289_v54, 8.507059e+37 }
  0xa1   :  { %v559_v53 = vpop.eup %558  ;;  %v522_v56 = vmul.f32 -1.442695, %v762_v49  ;;  %v292_v7 = vor.u32 1.1754944e-38, %v291_v55  ;;  %v526_v8 = vmul.f32 -1.442695, %v770_v57  ;;  %v796_v12 = vadd.f32 %v729_v24, %v126_v63 }
  0xa2   :  { %v561_v58 = vpop.eup %560  ;;  %v772_v59 = vadd.f32 1.0, %v559_v53  ;;  %v515_v11 = vmul.f32 -1.442695, %v775_v60 }
  0xa3   :  { %v563_v61 = vpop.eup %562  ;;  %v779_v62 = vadd.f32 1.0, %v561_v58  ;;  %v809_v25 = vmul.f32 -1.442695, %v796_v12 }
  0xa4   :  { %v565_v0 = vpop.eup %564  ;;  %v221_v1 = vmul.f32 %v563_v61, %v753_v43  ;;  %570 = vrcp.f32 %v772_v59  ;;  %vm226_vm6 = vweird.f32 %v563_v61  ;;  %v349_v14 = vand.u32 2147483647, %v772_v59 }
  0xa5   :  { %v567_v4 = vpop.eup %566  ;;  %v281_v5 = vmul.f32 %v565_v0, %v756_v45  ;;  %572 = vpow2.f32 %v522_v56  ;;  %v351_v15 = vand.u32 2147483648, %v772_v59  ;;  %v411_v17 = vand.u32 2147483648, %v779_v62  ;;  %vm227_vm9 = vmor %vm225_vm1, %vm226_vm6 }
  0xa6   :  { %v569_v9 = vpop.eup %568  ;;  %v222_v10 = vsub.f32 1.0, %v221_v1  ;;  %574 = vrcp.f32 %v779_v62  ;;  %v801_v18 = vadd.f32 1.0, %v567_v4  ;;  %vm286_vm7 = vweird.f32 %v565_v0  ;;  %v138_v32 = vpop.f32.mrf.mxu2 }
  0xa7   :  { %v282_v13 = vsub.f32 1.0, %v281_v5  ;;  %v803_v19 = vadd.f32 1.0, %v569_v9  ;;  %v409_v21 = vand.u32 2147483647, %v779_v62  ;;  %576 = vpow2.f32 %v526_v8  ;;  %vm287_vm12 = vmor %vm285_vm2, %vm286_vm7 }
  0xa8   :  { %v223_v16 = vmul.f32 %v563_v61, %v222_v10  ;;  %vm345_vm8 = vweird.f32 %v772_v59  ;;  %578 = vrcp.f32 %v801_v18  ;;  %vm815_vm10 = vcmp.eq.f32.partialorder %v349_v14, 8.507059e+37 }
  0xa9   :  { %v283_v20 = vmul.f32 %v565_v0, %v282_v13  ;;  %vm405_vm11 = vweird.f32 %v779_v62  ;;  %v352_v39 = vor.u32 1.1754944e-38, %v351_v15  ;;  %v412_v40 = vor.u32 1.1754944e-38, %v411_v17 }
  0xaa   :  { %v571_v22 = vpop.eup %570  ;;  %v224_v23 = vadd.f32 %v563_v61, %v223_v16  ;;  %580 = vrcp.f32 %v803_v19  ;;  %vm827_vm13 = vcmp.eq.f32.partialorder %v409_v21, 8.507059e+37  ;;  %v244_v48 = vand.u32 2147483647, %v801_v18 }
  0xab   :  { %v573_v26 = vpop.eup %572  ;;  %v284_v29 = vadd.f32 %v565_v0, %v283_v20  ;;  %v341_v30 = vmul.f32 %v571_v22, %v772_v59  ;;  %v836_v50 = vadd.f32 %v729_v24, %v138_v32  ;;  %vm346_vm14 = vweird.f32 %v571_v22  ;;  %v150_v20 = vpop.f32.mrf.mxu3 }
  0xac   :  { %v575_v35 = vpop.eup %574  ;;  %v228_v36 = vsel %vm227_vm9, %v563_v61, %v224_v23  ;;  %vm240_vm15 = vweird.f32 %v801_v18  ;;  %v845_v56 = vadd.f32 1.0, %v573_v26  ;;  %582 = vpow2.f32 %v515_v11  ;;  %vm347_vm1 = vmor %vm345_vm8, %vm346_vm14 }
  0xad   :  { %v233_v41 = vsel %vm782_vm3, %v232_v3, %v228_v36  ;;  %v288_v42 = vsel %vm287_vm12, %v565_v0, %v284_v29  ;;  %v342_v43 = vsub.f32 1.0, %v341_v30  ;;  %v401_v44 = vmul.f32 %v575_v35, %v779_v62  ;;  %v577_v51 = vpop.eup %576 }
  0xae   :  { %v460_v47 = vmul.f32 %v233_v41, %v732_v27  ;;  %v293_v45 = vsel %vm788_vm5, %v292_v7, %v288_v42  ;;  %v579_v55 = vpop.eup %578  ;;  %v246_v27 = vand.u32 2147483648, %v801_v18  ;;  %vm406_vm0 = vweird.f32 %v575_v35 }
  0xaf   :  { %v464_v52 = vmul.f32 %v293_v45, %v735_v28  ;;  %v343_v53 = vmul.f32 %v571_v22, %v342_v43  ;;  %v402_v54 = vsub.f32 1.0, %v401_v44  ;;  %v236_v61 = vmul.f32 %v579_v55, %v801_v18  ;;  %vm407_vm3 = vmor %vm405_vm11, %vm406_vm0  ;;  %v129_v45 = vpop.f32.mrf.mxu1 }
  0xb0   :  { %477 = vst.msk [vmem:[%s1068_s3] sm:$0xff] %vm476_vm4, %v460_v47  ;;  %v581_v63 = vpop.eup %580  ;;  %vm854_vm2 = vcmp.eq.f32.partialorder %v244_v48, 8.507059e+37  ;;  %v304_v1 = vand.u32 2147483647, %v803_v19  ;;  %584 = vrcp.f32 %v845_v56  ;;  %v860_v2 = vadd.f32 1.0, %v577_v51  ;;  %v117_v47 = vpop.f32.mrf.mxu0 }
  0xb1   :  { %481 = vst.msk [vmem:[%s1068_s3 + $0x20] sm:$0xff] %vm476_vm4, %v464_v52  ;;  %v344_v28 = vadd.f32 %v571_v22, %v343_v53  ;;  %v403_v58 = vmul.f32 %v575_v35, %v402_v54  ;;  %v237_v5 = vsub.f32 1.0, %v236_v61  ;;  %v296_v6 = vmul.f32 %v581_v63, %v803_v19 }
  0xb2   :  { %vm241_vm5 = vweird.f32 %v579_v55  ;;  %vm300_vm6 = vweird.f32 %v803_v19  ;;  %v306_v59 = vand.u32 2147483648, %v803_v19  ;;  %v583_v13 = vpop.eup %582  ;;  %v247_v15 = vor.u32 1.1754944e-38, %v246_v27 }
  0xb3   :  { %v348_v3 = vsel %vm347_vm1, %v571_v22, %v344_v28  ;;  %v404_v4 = vadd.f32 %v575_v35, %v403_v58  ;;  %v238_v10 = vmul.f32 %v579_v55, %v237_v5  ;;  %v297_v11 = vsub.f32 1.0, %v296_v6  ;;  %vm242_vm9 = vmor %vm240_vm15, %vm241_vm5 }
  0xb4   :  { %v353_v7 = vsel %vm815_vm10, %v352_v39, %v348_v3  ;;  %vm872_vm7 = vcmp.eq.f32.partialorder %v304_v1, 8.507059e+37  ;;  %586 = vrcp.f32 %v860_v2  ;;  %vm301_vm8 = vweird.f32 %v581_v63 }
  0xb5   :  { %v468_v8 = vmul.f32 %v353_v7, %v740_v33  ;;  %v408_v9 = vsel %vm407_vm3, %v575_v35, %v404_v4  ;;  %v239_v62 = vadd.f32 %v579_v55, %v238_v10  ;;  %v298_v17 = vmul.f32 %v581_v63, %v297_v11  ;;  %vm302_vm10 = vmor %vm300_vm6, %vm301_vm8  ;;  %v153_v4 = vpop.f32.mrf.mxu3 }
  0xb6   :  { %v413_v14 = vsel %vm827_vm13, %v412_v40, %v408_v9  ;;  %v585_v21 = vpop.eup %584  ;;  %v364_v22 = vand.u32 2147483647, %v845_v56  ;;  %v366_v23 = vand.u32 2147483648, %v845_v56  ;;  %v887_v26 = vadd.f32 1.0, %v583_v13 }
  0xb7   :  { %485 = vst.msk [vmem:[%s1068_s3 + $0x40] sm:$0xff] %vm476_vm4, %v468_v8  ;;  %v472_v33 = vmul.f32 %v413_v14, %v743_v34  ;;  %588 = vpow2.f32 %v809_v25  ;;  %v243_v34 = vsel %vm242_vm9, %v579_v55, %v239_v62  ;;  %v299_v29 = vadd.f32 %v581_v63, %v298_v17 }
  0xb8   :  { %v307_v30 = vor.u32 1.1754944e-38, %v306_v59  ;;  %v356_v31 = vmul.f32 %v585_v21, %v845_v56  ;;  %v248_v18 = vsel %vm854_vm2, %v247_v15, %v243_v34  ;;  %vm360_vm11 = vweird.f32 %v845_v56 }
  0xb9   :  { %489 = vst.msk [vmem:[%s1068_s3 + $0x60] sm:$0xff] %vm476_vm4, %v472_v33  ;;  %v424_v25 = vand.u32 2147483647, %v860_v2  ;;  %590 = vrcp.f32 %v887_v26  ;;  %v461_v32 = vmul.f32 %v248_v18, %v746_v37  ;;  %v303_v35 = vsel %vm302_vm10, %v581_v63, %v299_v29  ;;  %v141_v63 = vpop.f32.mrf.mxu2 }
  0xba   :  { %v357_v36 = vsub.f32 1.0, %v356_v31  ;;  %v426_v39 = vand.u32 2147483648, %v860_v2  ;;  %v587_v40 = vpop.eup %586  ;;  %v308_v41 = vsel %vm872_vm7, %v307_v30, %v303_v35  ;;  %vm906_vm12 = vcmp.eq.f32.partialorder %v364_v22, 8.507059e+37 }
  0xbb   :  { %v367_v19 = vor.u32 1.1754944e-38, %v366_v23  ;;  %v523_v43 = vmul.f32 -1.442695, %v836_v50  ;;  %478 = vst.msk [vmem:[%s1068_s3 + $0x8] sm:$0xff] %vm476_vm4, %v461_v32  ;;  %v465_v37 = vmul.f32 %v308_v41, %v749_v38  ;;  %vm361_vm13 = vweird.f32 %v585_v21 }
  0xbc   :  { %v358_v44 = vmul.f32 %v585_v21, %v357_v36  ;;  %v416_v46 = vmul.f32 %v587_v40, %v860_v2  ;;  %vm420_vm14 = vweird.f32 %v860_v2  ;;  %vm918_vm15 = vcmp.eq.f32.partialorder %v424_v25, 8.507059e+37  ;;  %vm362_vm0 = vmor %vm360_vm11, %vm361_vm13 }
  0xbd   :  { %v589_v48 = vpop.eup %588  ;;  %592 = vpow2.f32 %v523_v43  ;;  %v923_v52 = vadd.f32 %v729_v24, %v150_v20  ;;  %482 = vst.msk [vmem:[%s1068_s3 + $0x28] sm:$0xff] %vm476_vm4, %v465_v37  ;;  %v427_v54 = vor.u32 1.1754944e-38, %v426_v39  ;;  %vm255_vm1 = vweird.f32 %v887_v26 }
  0xbe   :  { %v359_v38 = vadd.f32 %v585_v21, %v358_v44  ;;  %v417_v53 = vsub.f32 1.0, %v416_v46  ;;  %v929_v55 = vadd.f32 1.0, %v589_v48  ;;  %v937_v58 = vadd.f32 %v729_v24, %v117_v47 }
  0xbf   :  { %v591_v27 = vpop.eup %590  ;;  %v527_v28 = vmul.f32 -1.442695, %v923_v52  ;;  %v940_v61 = vadd.f32 %v729_v24, %v129_v45  ;;  %vm421_vm2 = vweird.f32 %v587_v40  ;;  %v259_v5 = vand.u32 2147483647, %v887_v26 }
  0xc0   :  { %v363_v0 = vsel %vm362_vm0, %v585_v21, %v359_v38  ;;  %v418_v1 = vmul.f32 %v587_v40, %v417_v53  ;;  %v251_v3 = vmul.f32 %v591_v27, %v887_v26  ;;  %v261_v6 = vand.u32 2147483648, %v887_v26  ;;  %vm422_vm3 = vmor %vm420_vm14, %vm421_vm2 }
  0xc1   :  { %v368_v56 = vsel %vm906_vm12, %v367_v19, %v363_v0  ;;  %594 = vrcp.f32 %v929_v55  ;;  %v950_v9 = vadd.f32 %v729_v24, %v141_v63  ;;  %v516_v11 = vmul.f32 -1.442695, %v937_v58 }
  0xc2   :  { %v469_v7 = vmul.f32 %v368_v56, %v762_v49  ;;  %v419_v59 = vadd.f32 %v587_v40, %v418_v1  ;;  %v252_v8 = vsub.f32 1.0, %v251_v3  ;;  %596 = vpow2.f32 %v527_v28 }
  0xc3   :  { %v593_v10 = vpop.eup %592  ;;  %v520_v13 = vmul.f32 -1.442695, %v940_v61  ;;  %v957_v14 = vadd.f32 %v729_v24, %v153_v4  ;;  %vm256_vm5 = vweird.f32 %v591_v27  ;;  %598 = vpow2.f32 %v516_v11 }
  0xc4   :  { %486 = vst.msk [vmem:[%s1068_s3 + $0x48] sm:$0xff] %vm476_vm4, %v469_v7  ;;  %v423_v49 = vsel %vm422_vm3, %v587_v40, %v419_v59  ;;  %v253_v15 = vmul.f32 %v591_v27, %v252_v8  ;;  %v214_v16 = vadd.f32 1.0, %v593_v10  ;;  %v524_v24 = vmul.f32 -1.442695, %v950_v9  ;;  %vm257_vm6 = vmor %vm255_vm1, %vm256_vm5 }
  0xc5   :  { %v428_v2 = vsel %vm918_vm15, %v427_v54, %v423_v49  ;;  %v262_v20 = vor.u32 1.1754944e-38, %v261_v6  ;;  %v528_v21 = vmul.f32 -1.442695, %v957_v14  ;;  %vm260_vm7 = vcmp.eq.f32.partialorder %v259_v5, 8.507059e+37 }
  0xc6   :  { %v473_v33 = vmul.f32 %v428_v2, %v770_v57  ;;  %v254_v62 = vadd.f32 %v591_v27, %v253_v15  ;;  %600 = vrcp.f32 %v214_v16  ;;  %v319_v18 = vand.u32 2147483647, %v929_v55 }
  0xc7   :  { %v595_v17 = vpop.eup %594  ;;  %602 = vpow2.f32 %v520_v13  ;;  %v321_v25 = vand.u32 2147483648, %v929_v55  ;;  %vm315_vm8 = vweird.f32 %v929_v55  ;;  %v379_v44 = vand.u32 2147483647, %v214_v16 }
  0xc8   :  { %490 = vst.msk [vmem:[%s1068_s3 + $0x68] sm:$0xff] %vm476_vm4, %v473_v33  ;;  %v258_v22 = vsel %vm257_vm6, %v591_v27, %v254_v62  ;;  %v311_v57 = vmul.f32 %v595_v17, %v929_v55  ;;  %v597_v23 = vpop.eup %596  ;;  %604 = vpow2.f32 %v524_v24  ;;  %vm316_vm9 = vweird.f32 %v595_v17 }
  0xc9   :  { %v263_v34 = vsel %vm260_vm7, %v262_v20, %v258_v22  ;;  %v976_v26 = vadd.f32 1.0, %v597_v23  ;;  %v599_v31 = vpop.eup %598  ;;  %606 = vpow2.f32 %v528_v21  ;;  %vm317_vm10 = vmor %vm315_vm8, %vm316_vm9  ;;  %vm320_vm11 = vcmp.eq.f32.partialorder %v319_v18, 8.507059e+37 }
  0xca   :  { %v462_v29 = vmul.f32 %v263_v34, %v775_v60  ;;  %v312_v30 = vsub.f32 1.0, %v311_v57  ;;  %v986_v39 = vadd.f32 1.0, %v599_v31  ;;  %v322_v42 = vor.u32 1.1754944e-38, %v321_v25 }
  0xcb   :  { %608 = vrcp.f32 %v976_v26  ;;  %v381_v46 = vand.u32 2147483648, %v214_v16  ;;  %v439_v53 = vand.u32 2147483647, %v976_v26  ;;  %vm375_vm13 = vweird.f32 %v214_v16 }
  0xcc   :  { %v601_v32 = vpop.eup %600  ;;  %479 = vst.msk [vmem:[%s1068_s3 + $0x10] sm:$0xff] %vm476_vm4, %v462_v29  ;;  %v313_v35 = vmul.f32 %v595_v17, %v312_v30  ;;  %610 = vrcp.f32 %v986_v39  ;;  %vm380_vm15 = vcmp.eq.f32.partialorder %v379_v44, 8.507059e+37  ;;  %v441_v28 = vand.u32 2147483648, %v976_v26 }
  0xcd   :  { %v603_v60 = vpop.eup %602  ;;  %v371_v36 = vmul.f32 %v601_v32, %v214_v16  ;;  %vm376_vm12 = vweird.f32 %v601_v32  ;;  %v382_v27 = vor.u32 1.1754944e-38, %v381_v46  ;;  %vm435_vm0 = vweird.f32 %v976_v26 }
  0xce   :  { %v314_v40 = vadd.f32 %v595_v17, %v313_v35  ;;  %v988_v41 = vadd.f32 1.0, %v603_v60  ;;  %v605_v43 = vpop.eup %604  ;;  %vm377_vm14 = vmor %vm375_vm13, %vm376_vm12  ;;  %vm1005_vm1 = vcmp.eq.f32.partialorder %v439_v53, 8.507059e+37  ;;  %v442_v10 = vor.u32 1.1754944e-38, %v441_v28 }
  0xcf   :  { %v372_v19 = vsub.f32 1.0, %v371_v36  ;;  %v607_v47 = vpop.eup %606  ;;  %v1000_v63 = vadd.f32 1.0, %v605_v43  ;;  %vm270_vm3 = vweird.f32 %v986_v39  ;;  %v274_v13 = vand.u32 2147483647, %v986_v39 }
  0xd0   :  { %v318_v37 = vsel %vm317_vm10, %v595_v17, %v314_v40  ;;  %612 = vrcp.f32 %v988_v41  ;;  %v1003_v3 = vadd.f32 1.0, %v607_v47  ;;  %v276_v15 = vand.u32 2147483648, %v986_v39 }
  0xd1   :  { %v323_v45 = vsel %vm320_vm11, %v322_v42, %v318_v37  ;;  %v373_v48 = vmul.f32 %v601_v32, %v372_v19  ;;  %v609_v51 = vpop.eup %608  ;;  %614 = vrcp.f32 %v1000_v63  ;;  %vm330_vm7 = vweird.f32 %v988_v41 }
  0xd2   :  { %v466_v38 = vmul.f32 %v323_v45, %v796_v12  ;;  %v431_v55 = vmul.f32 %v609_v51, %v976_v26  ;;  %v611_v0 = vpop.eup %610  ;;  %vm436_vm2 = vweird.f32 %v609_v51  ;;  %616 = vrcp.f32 %v1003_v3 }
  0xd3   :  { %v374_v54 = vadd.f32 %v601_v32, %v373_v48  ;;  %v266_v6 = vmul.f32 %v611_v0, %v986_v39  ;;  %vm437_vm5 = vmor %vm435_vm0, %vm436_vm2  ;;  %vm271_vm6 = vweird.f32 %v611_v0  ;;  %v336_v2 = vand.u32 2147483648, %v988_v41 }
  0xd4   :  { %483 = vst.msk [vmem:[%s1068_s3 + $0x30] sm:$0xff] %vm476_vm4, %v466_v38  ;;  %v432_v1 = vsub.f32 1.0, %v431_v55  ;;  %v334_v24 = vand.u32 2147483647, %v988_v41  ;;  %vm272_vm9 = vmor %vm270_vm3, %vm271_vm6  ;;  %v277_v57 = vor.u32 1.1754944e-38, %v276_v15  ;;  %vm275_vm10 = vcmp.eq.f32.partialorder %v274_v13, 8.507059e+37 }
  0xd5   :  { %v378_v12 = vsel %vm377_vm14, %v601_v32, %v374_v54  ;;  %v267_v11 = vsub.f32 1.0, %v266_v6  ;;  %v337_v30 = vor.u32 1.1754944e-38, %v336_v2  ;;  %v396_v35 = vand.u32 2147483648, %v1000_v63 }
  0xd6   :  { %v613_v4 = vpop.eup %612  ;;  %v383_v56 = vsel %vm380_vm15, %v382_v27, %v378_v12  ;;  %v433_v59 = vmul.f32 %v609_v51, %v432_v1  ;;  %vm335_vm12 = vcmp.eq.f32.partialorder %v334_v24, 8.507059e+37  ;;  %v394_v40 = vand.u32 2147483647, %v1000_v63 }
  0xd7   :  { %v470_v7 = vmul.f32 %v383_v56, %v836_v50  ;;  %v326_v8 = vmul.f32 %v613_v4, %v988_v41  ;;  %v268_v50 = vmul.f32 %v611_v0, %v267_v11  ;;  %vm331_vm8 = vweird.f32 %v613_v4  ;;  %v615_v17 = vpop.eup %614 }
  0xd8   :  { %v434_v49 = vadd.f32 %v609_v51, %v433_v59  ;;  %v386_v34 = vmul.f32 %v615_v17, %v1000_v63  ;;  %vm332_vm11 = vmor %vm330_vm7, %vm331_vm8  ;;  %v617_v26 = vpop.eup %616  ;;  %vm391_vm13 = vweird.f32 %v615_v17  ;;  %vm390_vm14 = vweird.f32 %v1000_v63 }
  0xd9   :  { %487 = vst.msk [vmem:[%s1068_s3 + $0x50] sm:$0xff] %vm476_vm4, %v470_v7  ;;  %v327_v16 = vsub.f32 1.0, %v326_v8  ;;  %v269_v21 = vadd.f32 %v611_v0, %v268_v50  ;;  %v446_v60 = vmul.f32 %v617_v26, %v1003_v3  ;;  %vm392_vm15 = vmor %vm390_vm14, %vm391_vm13  ;;  %v397_v42 = vor.u32 1.1754944e-38, %v396_v35 }
  0xda   :  { %v438_v33 = vsel %vm437_vm5, %v609_v51, %v434_v49  ;;  %v387_v18 = vsub.f32 1.0, %v386_v34  ;;  %vm451_vm0 = vweird.f32 %v617_v26  ;;  %v454_v43 = vand.u32 2147483647, %v1003_v3 }
  0xdb   :  { %v328_v62 = vmul.f32 %v613_v4, %v327_v16  ;;  %v443_v20 = vsel %vm1005_vm1, %v442_v10, %v438_v33  ;;  %v273_v29 = vsel %vm272_vm9, %v611_v0, %v269_v21  ;;  %v447_v41 = vsub.f32 1.0, %v446_v60 }
  0xdc   :  { %v474_v22 = vmul.f32 %v443_v20, %v923_v52  ;;  %v278_v52 = vsel %vm275_vm10, %v277_v57, %v273_v29  ;;  %v388_v39 = vmul.f32 %v615_v17, %v387_v18  ;;  %vm395_vm1 = vcmp.eq.f32.partialorder %v394_v40, 8.507059e+37 }
  0xdd   :  { %v329_v23 = vadd.f32 %v613_v4, %v328_v62  ;;  %v463_v25 = vmul.f32 %v278_v52, %v937_v58  ;;  %v448_v19 = vmul.f32 %v617_v26, %v447_v41  ;;  %vm450_vm2 = vweird.f32 %v1003_v3 }
  0xde   :  { %491 = vst.msk [vmem:[%s1068_s3 + $0x70] sm:$0xff] %vm476_vm4, %v474_v22  ;;  %v389_v58 = vadd.f32 %v615_v17, %v388_v39  ;;  %vm452_vm3 = vmor %vm450_vm2, %vm451_vm0  ;;  %vm455_vm5 = vcmp.eq.f32.partialorder %v454_v43, 8.507059e+37 }
  0xdf   :  { %v333_v31 = vsel %vm332_vm11, %v613_v4, %v329_v23  ;;  %480 = vst.msk [vmem:[%s1068_s3 + $0x18] sm:$0xff] %vm476_vm4, %v463_v25  ;;  %v449_v46 = vadd.f32 %v617_v26, %v448_v19 }
  0xe0   :  { %v338_v32 = vsel %vm335_vm12, %v337_v30, %v333_v31  ;;  %v393_v37 = vsel %vm392_vm15, %v615_v17, %v389_v58 }
  0xe1   :  { %v467_v36 = vmul.f32 %v338_v32, %v940_v61  ;;  %v456_v61 = vand.u32 2147483648, %v1003_v3  ;;  %v398_v44 = vsel %vm395_vm1, %v397_v42, %v393_v37  ;;  %v453_v48 = vsel %vm452_vm3, %v617_v26, %v449_v46 }
  0xe2   :  { %v471_v47 = vmul.f32 %v398_v44, %v950_v9 }
  0xe3   :  { %484 = vst.msk [vmem:[%s1068_s3 + $0x38] sm:$0xff] %vm476_vm4, %v467_v36  ;;  %v457_v45 = vor.u32 1.1754944e-38, %v456_v61 }
  0xe4   :  { %488 = vst.msk [vmem:[%s1068_s3 + $0x58] sm:$0xff] %vm476_vm4, %v471_v47 }
  0xe5   :  { %v458_v51 = vsel %vm455_vm5, %v457_v45, %v453_v48 }
  0xe6   :  { %v475_v38 = vmul.f32 %v458_v51, %v957_v14 }
  0xe8   :  { %492 = vst.msk [vmem:[%s1068_s3 + $0x78] sm:$0xff] %vm476_vm4, %v475_v38 }

// kernel: mobilevit_deeplabv3_forward.3
= control target key start
LH: loop header
LB: loop body
LE: loop exit
PB: predicated region body
PF: predicated region fallthrough
CT: control target
= control target key end

     0   :  { %s1754_s23 = smov 0   ;;  %s2102_s0 = inlined_call_operand.vmem [shape: f32[2,16,256], index: 0, kind: input, shape index: {}]   ;;  %s2103_s1 = inlined_call_operand.vmem [shape: f32[256,32], index: 1, kind: input, shape index: {}]   ;;  %s2104_s2 = inlined_call_operand.vmem [shape: f32[1,32], index: 2, kind: input, shape index: {}]   ;;  %s2105_s3 = inlined_call_operand.vmem [shape: f32[2,32], index: 3, kind: input, shape index: {}]   ;;  %s2106_s4 = inlined_call_operand.vmem [shape: f32[3,32,32], index: 4, kind: input, shape index: {}]   ;;  %s2107_s5 = inlined_call_operand.vmem [shape: f32[3,1,32], index: 5, kind: input, shape index: {}]   ;;  %s2108_s6 = inlined_call_operand.vmem [shape: f32[32,32], index: 6, kind: input, shape index: {}]   ;;  %s2109_s7 = inlined_call_operand.vmem [shape: f32[1,32], index: 7, kind: input, shape index: {}]   ;;  %s2110_s8 = inlined_call_operand.vmem [shape: f32[2,32], index: 8, kind: input, shape index: {}]   ;;  %s2111_s9 = inlined_call_operand.vmem [shape: f32[32,64], index: 9, kind: input, shape index: {}]   ;;  %s2112_s10 = inlined_call_operand.vmem [shape: f32[1,64], index: 10, kind: input, shape index: {}]   ;;  %s2113_s11 = inlined_call_operand.vmem [shape: f32[64,32], index: 11, kind: input, shape index: {}]   ;;  %s2114_s12 = inlined_call_operand.vmem [shape: f32[1,32], index: 12, kind: input, shape index: {}]   ;;  %s2115_s13 = inlined_call_operand.vmem [shape: f32[32,32], index: 13, kind: input, shape index: {}]   ;;  %s2116_s14 = inlined_call_operand.vmem [shape: f32[1,32], index: 14, kind: input, shape index: {}]   ;;  %s2117_s15 = inlined_call_operand.vmem [shape: f32[32,32], index: 15, kind: input, shape index: {}]   ;;  %s2118_s16 = inlined_call_operand.vmem [shape: f32[1,32], index: 16, kind: input, shape index: {}]   ;;  %s2119_s17 = inlined_call_operand.vmem [shape: f32[1,32], index: 17, kind: input, shape index: {}]   ;;  %s2120_s18 = inlined_call_operand.<no memory space> [shape: f32[1,1], index: 18, kind: input, shape index: {}]   ;;  %s2121_s19 = inlined_call_operand.vmem [shape: f32[16,256], index: 19, kind: input, shape index: {}]   ;;  %s2122_s20 = inlined_call_operand.vmem [shape: f32[2,1,256], index: 20, kind: output, shape index: {}]  }
   0x1   :  { %2125 = sst [smem:[#allocation3_spill]] %s2102_s0  ;;  %v25_v0 = vstv %s2120_s18 }
   0x2   :  { %2126 = sst [smem:[#allocation4_spill]] %s2103_s1  ;;  %26 = vst [vmem:[#allocation2] sm:$0x1] %v25_v0 }
   0x3   :  { %2127 = sst [smem:[#allocation5_spill]] %s2104_s2 }
   0x4   :  { %2128 = sst [smem:[#allocation6_spill]] %s2105_s3 }
   0x5   :  { %2129 = sst [smem:[#allocation7_spill]] %s2106_s4 }
   0x6 LB: > { %s1512_s24 = sadd.s32 4294967295, %s1642_s23   ;;  %p1516_p0 = scmp.ge.s32.totalorder %s1642_s23, 1  ;;  %s1642_s23 = sphi %s1754_s23, %s32_s23  }
   0x7   : > { %p564_p1 = scmp.lt.s32.totalorder %s1642_s23, 3 }
   0x9   : > { %p565_p2 = pnand %p1516_p0, %p564_p1 }
   0xa   : > { %s2130_s3 = sld [smem:[#allocation4_spill]] (!%p565_p2)  ;;  %p621_p3 = scmp.lt.s32.totalorder (!%p565_p2), %s1512_s24, 1 }
   0xb   : > { %568 = sbr.rel (%p565_p2) target bundleno = 2439 (0x987), region = 100  ;;  %s2131_s1 = sld [smem:[#allocation3_spill]] (!%p565_p2) }
   0xc   : > { %s2132_s4 = sld [smem:[#allocation5_spill]] (!%p565_p2) }
   0xd   : > { %s2133_s0 = sld [smem:[#allocation7_spill]] (!%p565_p2) }
   0xe   : > { %s2134_s21 = sld [smem:[#allocation6_spill]] (!%p565_p2) }
  0x10   : > { %v649_v1 = vld [vmem:[%s2130_s3 + $0x78] sm:$0xff]  ;;  %v648_v2 = vld [vmem:[%s2130_s3 + $0x70] sm:$0xff]  ;;  %v647_v5 = vld [vmem:[%s2130_s3 + $0x68] sm:$0xff]  ;;  %s2136_s24 = smov (!%p621_p3, %s1512_s24), 1  ;;  %vm757_vm4 = vcmask 261120  }
  0x11   : > { %v665_v3 = vld [vmem:[%s2130_s3 + $0xf8] sm:$0xff]  ;;  %670 = vmatpush.msra.mxu0 %v649_v1  ;;  %v664_v4 = vld [vmem:[%s2130_s3 + $0xf0] sm:$0xff]  ;;  %v663_v6 = vld [vmem:[%s2130_s3 + $0xe8] sm:$0xff]  ;;  %s1562_s2 = sshll.u32 %s2136_s24, 5  ;;  %s1519_s26 = sshll.u32 %s2136_s24, 1 }
  0x12   : > { %693 = vmatpush.msra.mxu1 %v665_v3  ;;  %v646_v7 = vld [vmem:[%s2130_s3 + $0x60] sm:$0xff]  ;;  %v645_v9 = vld [vmem:[%s2130_s3 + $0x58] sm:$0xff]  ;;  %v644_v11 = vld [vmem:[%s2130_s3 + $0x50] sm:$0xff]  ;;  %s625_s22 = scalar_lea.vmem %s2131_s1, %s1562_s2  ;;  %s629_s28 = scalar_lea.vmem %s2122_s20, %s1519_s26 }
  0x13   : > { %671 = vmatpush.msra.mxu0 %v648_v2  ;;  %v662_v8 = vld [vmem:[%s2130_s3 + $0xe0] sm:$0xff]  ;;  %v661_v10 = vld [vmem:[%s2130_s3 + $0xd8] sm:$0xff]  ;;  %v660_v12 = vld [vmem:[%s2130_s3 + $0xd0] sm:$0xff] }
  0x14   : > { %694 = vmatpush.msra.mxu1 %v664_v4  ;;  %v643_v13 = vld [vmem:[%s2130_s3 + $0x48] sm:$0xff]  ;;  %v642_v15 = vld [vmem:[%s2130_s3 + $0x40] sm:$0xff]  ;;  %v641_v17 = vld [vmem:[%s2130_s3 + $0x38] sm:$0xff] }
  0x15   : > { %672 = vmatpush.msra.mxu0 %v647_v5  ;;  %v659_v14 = vld [vmem:[%s2130_s3 + $0xc8] sm:$0xff]  ;;  %v658_v16 = vld [vmem:[%s2130_s3 + $0xc0] sm:$0xff]  ;;  %v657_v18 = vld [vmem:[%s2130_s3 + $0xb8] sm:$0xff] }
  0x16   : > { %695 = vmatpush.msra.mxu1 %v663_v6  ;;  %v640_v19 = vld [vmem:[%s2130_s3 + $0x30] sm:$0xff]  ;;  %v639_v21 = vld [vmem:[%s2130_s3 + $0x28] sm:$0xff]  ;;  %v638_v23 = vld [vmem:[%s2130_s3 + $0x20] sm:$0xff] }
  0x17   : > { %673 = vmatpush.msra.mxu0 %v646_v7  ;;  %v656_v20 = vld [vmem:[%s2130_s3 + $0xb0] sm:$0xff]  ;;  %v655_v22 = vld [vmem:[%s2130_s3 + $0xa8] sm:$0xff]  ;;  %v654_v24 = vld [vmem:[%s2130_s3 + $0xa0] sm:$0xff] }
  0x18   : > { %696 = vmatpush.msra.mxu1 %v662_v8  ;;  %v637_v25 = vld [vmem:[%s2130_s3 + $0x18] sm:$0xff]  ;;  %v636_v27 = vld [vmem:[%s2130_s3 + $0x10] sm:$0xff]  ;;  %v635_v29 = vld [vmem:[%s2130_s3 + $0x8] sm:$0xff] }
  0x19   : > { %674 = vmatpush.msra.mxu0 %v645_v9  ;;  %v653_v26 = vld [vmem:[%s2130_s3 + $0x98] sm:$0xff]  ;;  %v652_v28 = vld [vmem:[%s2130_s3 + $0x90] sm:$0xff]  ;;  %v651_v30 = vld [vmem:[%s2130_s3 + $0x88] sm:$0xff] }
  0x1a   : > { %697 = vmatpush.msra.mxu1 %v661_v10  ;;  %v634_v31 = vld [vmem:[%s2130_s3] sm:$0xff]  ;;  %v631_v34 = vld [vmem:[%s625_s22 + $0x8] sm:$0xff]  ;;  %v632_v35 = vld [vmem:[%s625_s22 + $0x10] sm:$0xff] }
  0x1b   : > { %675 = vmatpush.msra.mxu0 %v644_v11  ;;  %v650_v32 = vld [vmem:[%s2130_s3 + $0x80] sm:$0xff]  ;;  %v633_v36 = vld [vmem:[%s625_s22 + $0x18] sm:$0xff] }
  0x1c   : > { %698 = vmatpush.msra.mxu1 %v660_v12  ;;  %v630_v33 = vld [vmem:[%s625_s22] sm:$0xff]  ;;  %v1644_v12 = vmov 32.0  }
  0x1d   : > { %676 = vmatpush.msra.mxu0 %v643_v13  ;;  %v1575_v37 = vld [vmem:[%s2132_s4] ss:$0 sm:$0xff] }
  0x1e   : > { %699 = vmatpush.msra.mxu1 %v659_v14 }
  0x1f   : > { %677 = vmatpush.msra.mxu0 %v642_v15 }
  0x20   : > { %700 = vmatpush.msra.mxu1 %v658_v16 }
  0x21   : > { %678 = vmatpush.msra.mxu0 %v641_v17 }
  0x22   : > { %701 = vmatpush.msra.mxu1 %v657_v18 }
  0x23   : > { %679 = vmatpush.msra.mxu0 %v640_v19 }
  0x24   : > { %702 = vmatpush.msra.mxu1 %v656_v20 }
  0x25   : > { %680 = vmatpush.msra.mxu0 %v639_v21 }
  0x26   : > { %703 = vmatpush.msra.mxu1 %v655_v22 }
  0x27   : > { %681 = vmatpush.msra.mxu0 %v638_v23 }
  0x28   : > { %704 = vmatpush.msra.mxu1 %v654_v24 }
  0x29   : > { %682 = vmatpush.msra.mxu0 %v637_v25 }
  0x2a   : > { %705 = vmatpush.msra.mxu1 %v653_v26 }
  0x2b   : > { %683 = vmatpush.msra.mxu0 %v636_v27 }
  0x2c   : > { %706 = vmatpush.msra.mxu1 %v652_v28 }
  0x2d   : > { %684 = vmatpush.msra.mxu0 %v635_v29  ;;  %v818_v29 = vld [vmem:[%s2133_s0 + $0x18] sm:$0xff] }
  0x2e   : > { %707 = vmatpush.msra.mxu1 %v651_v30  ;;  %v1527_v30 = vld [vmem:[%s2133_s0 + $0x38] sm:$0xff]  ;;  %841 = vmatpush.msra.mxu2 %v818_v29 }
  0x2f   : > { %685 = vmatpush.msra.mxu0 %v634_v31  ;;  %874 = vmatpush.msra.mxu3 %v1527_v30  ;;  %v817_v31 = vld [vmem:[%s2133_s0 + $0x10] sm:$0xff] }
  0x30   : > { %708 = vmatpush.msra.mxu1 %v650_v32  ;;  %686 = vmatmul.f32.vlgmr.msra.gmra.mxu0 %v630_v33  ;;  %v1526_v32 = vld [vmem:[%s2133_s0 + $0x30] sm:$0xff]  ;;  %v816_v33 = vld [vmem:[%s2133_s0 + $0x8] sm:$0xff] }
  0x31   : > { %709 = vmatmul.f32.vlgmr.msra.gmra.mxu1 %v631_v34  ;;  %842 = vmatpush.msra.mxu2 %v817_v31  ;;  %v1525_v34 = vld [vmem:[%s2133_s0 + $0x28] sm:$0xff] }
  0x32   : > { %875 = vmatpush.msra.mxu3 %v1526_v32 }
  0x33   : > { %843 = vmatpush.msra.mxu2 %v816_v33 }
  0x34   : > { %876 = vmatpush.msra.mxu3 %v1525_v34 }
  0x38   : > { %689 = vmatmul.f32.gmra.mxu0 %v632_v35  ;;  %v815_v35 = vld [vmem:[%s2133_s0] sm:$0xff] }
  0x39   : > { %712 = vmatmul.f32.gmra.mxu1 %v633_v36  ;;  %v1524_v36 = vld [vmem:[%s2133_s0 + $0x20] sm:$0xff]  ;;  %844 = vmatpush.msra.mxu2 %v815_v35 }
  0x3a   : > { %877 = vmatpush.msra.mxu3 %v1524_v36 }
  0xad   : > { %v687_v38 = vpop.f32.mrf.mxu0 }
  0xae   : > { %v710_v39 = vpop.f32.mrf.mxu1  ;;  %v688_v40 = vadd.f32 %v1575_v37, %v687_v38 }
  0xb0   : > { %v711_v41 = vadd.f32 %v710_v39, %v688_v40  ;;  %v1534_v40 = vld [vmem:[%s2133_s0 + $0x58] sm:$0xff] }
  0xb1   : > { %907 = vmatpush.msrb.mxu2 %v1534_v40  ;;  %v1036_v40 = vld [vmem:[%s2108_s6 + $0x18] sm:$0xff] }
  0xb2   : > { %v1520_v42 = vmul.f32 -1.442695, %v711_v41 }
  0xb4   : > { %1586 = vpow2.f32 %v1520_v42  ;;  %v1532_v42 = vld [vmem:[%s2133_s0 + $0x48] sm:$0xff] }
  0xb5   : > { %v690_v43 = vpop.f32.mrf.mxu0 }
  0xb6   : > { %v713_v44 = vpop.f32.mrf.mxu1  ;;  %v691_v45 = vadd.f32 %v1575_v37, %v690_v43 }
  0xb8   : > { %v714_v46 = vadd.f32 %v713_v44, %v691_v45  ;;  %v1531_v45 = vld [vmem:[%s2133_s0 + $0x40] sm:$0xff] }
  0xba   : > { %v1587_v47 = vpop.eup %1586  ;;  %v1521_v48 = vmul.f32 -1.442695, %v714_v46 }
  0xbb   : > { %v722_v49 = vadd.f32 1.0, %v1587_v47 }
  0xbc   : > { %1588 = vpow2.f32 %v1521_v48 }
  0xbd   : > { %1590 = vrcp.f32 %v722_v49  ;;  %v735_v55 = vand.u32 2147483648, %v722_v49  ;;  %v733_v57 = vand.u32 2147483647, %v722_v49  ;;  %vm729_vm1 = vweird.f32 %v722_v49 }
  0xbf   : > { %v736_v60 = vor.u32 1.1754944e-38, %v735_v55  ;;  %vm734_vm3 = vcmp.eq.f32.partialorder %v733_v57, 8.507059e+37 }
  0xc2   : > { %v1589_v50 = vpop.eup %1588 }
  0xc3   : > { %v1591_v51 = vpop.eup %1590  ;;  %v723_v52 = vadd.f32 1.0, %v1589_v50 }
  0xc4   : > { %v725_v53 = vmul.f32 %v1591_v51, %v722_v49  ;;  %vm730_vm0 = vweird.f32 %v1591_v51 }
  0xc5   : > { %1592 = vrcp.f32 %v723_v52  ;;  %vm731_vm2 = vmor %vm729_vm1, %vm730_vm0  ;;  %v750_v2 = vand.u32 2147483648, %v723_v52  ;;  %v748_v4 = vand.u32 2147483647, %v723_v52  ;;  %vm744_vm6 = vweird.f32 %v723_v52 }
  0xc6   : > { %v726_v54 = vsub.f32 1.0, %v725_v53  ;;  %1594 = vrcp.f32 %v1644_v12  ;;  %vm955_vm0 = vcmask 130048  }
  0xc7   : > { %v751_v7 = vor.u32 1.1754944e-38, %v750_v2  ;;  %vm749_vm8 = vcmp.eq.f32.partialorder %v748_v4, 8.507059e+37 }
  0xc8   : > { %v727_v56 = vmul.f32 %v1591_v51, %v726_v54 }
  0xca   : > { %v728_v58 = vadd.f32 %v1591_v51, %v727_v56 }
  0xcb   : > { %v1593_v59 = vpop.eup %1592 }
  0xcc   : > { %v732_v61 = vsel %vm731_vm2, %v1591_v51, %v728_v58  ;;  %v740_v62 = vmul.f32 %v1593_v59, %v723_v52  ;;  %vm745_vm5 = vweird.f32 %v1593_v59  ;;  %v1595_v13 = vpop.eup %1594  ;;  %v756_v52 = vld [vmem:[%s2134_s21] sm:$0x3] }
  0xcd   : > { %v737_v63 = vsel %vm734_vm3, %v736_v60, %v732_v61  ;;  %vm746_vm7 = vmor %vm744_vm6, %vm745_vm5  ;;  %v765_v14 = vmul.f32 32.0, %v1595_v13  ;;  %vm769_vm9 = vweird.f32 %v1595_v13  ;;  %v809_v56 = vperm.slane %v756_v52, 0 }
  0xce   : > { %v1871_v0 = vmul.f32 %v737_v63, %v711_v41  ;;  %v741_v1 = vsub.f32 1.0, %v740_v62  ;;  %v1533_v41 = vld [vmem:[%s2133_s0 + $0x50] sm:$0xff]  ;;  %v812_v60 = vperm.slane %v756_v52, 1 }
  0xcf   : > { %v766_v15 = vsub.f32 1.0, %v765_v14  ;;  %908 = vmatpush.msrb.mxu2 %v1533_v41  ;;  %v1576_v14 = vld [vmem:[%s2107_s5] ss:$0 sm:$0xff]  ;;  %v1035_v41 = vld [vmem:[%s2108_s6 + $0x10] sm:$0xff] }
  0xd0   : > { %v742_v3 = vmul.f32 %v1593_v59, %v741_v1  ;;  %v758_v5 = vsel %vm757_vm4, %v1871_v0, 0.0 }
  0xd1   : > { %759 = vadd.xlane.f32.xlu0 %v758_v5  ;;  %v767_v16 = vmul.f32 %v1595_v13, %v766_v15  ;;  %909 = vmatpush.msrb.mxu2 %v1532_v42  ;;  %v1034_v42 = vld [vmem:[%s2108_s6 + $0x8] sm:$0xff] }
  0xd2   : > { %v743_v6 = vadd.f32 %v1593_v59, %v742_v3 }
  0xd3   : > { %v768_v17 = vadd.f32 %v1595_v13, %v767_v16  ;;  %910 = vmatpush.msrb.mxu2 %v1531_v45 }
  0xd4   : > { %v747_v8 = vsel %vm746_vm7, %v1593_v59, %v743_v6 }
  0xd5   : > { %v752_v9 = vsel %vm749_vm8, %v751_v7, %v747_v8  ;;  %v1879_v18 = vsel %vm769_vm9, %v1595_v13, %v768_v17 }
  0xd6   : > { %v1875_v10 = vmul.f32 %v752_v9, %v714_v46  ;;  %v1577_v9 = vld [vmem:[%s2107_s5 + $0x1] ss:$0 sm:$0xff] }
  0xd8   : > { %v761_v11 = vsel %vm757_vm4, %v1875_v10, 0.0 }
  0xd9   : > { %762 = vadd.xlane.f32.xlu0 %v761_v11 }
 0x144   : > { %v760_v19 = vpop.xlane.xlu0 %759 }
 0x145   : > { %v771_v20 = vmul.f32 %v1879_v18, %v760_v19  ;;  %v1578_v19 = vld [vmem:[%s2107_s5 + $0x2] ss:$0 sm:$0xff] }
 0x147   : > { %v773_v21 = vsub.f32 %v1871_v0, %v771_v20 }
 0x149   : > { %v775_v22 = vmul.f32 %v773_v21, %v773_v21 }
 0x14b   : > { %v777_v23 = vsel %vm757_vm4, %v775_v22, 0.0 }
 0x14c   : > { %778 = vadd.xlane.f32.xlu1 %v777_v23  ;;  %v763_v24 = vpop.xlane.xlu0 %762 }
 0x14d   : > { %v772_v25 = vmul.f32 %v1879_v18, %v763_v24 }
 0x14f   : > { %v1886_v26 = vsub.f32 %v1875_v10, %v772_v25 }
 0x151   : > { %v776_v27 = vmul.f32 %v1886_v26, %v1886_v26 }
 0x153   : > { %v780_v28 = vsel %vm757_vm4, %v776_v27, 0.0 }
 0x154   : > { %781 = vadd.xlane.f32.xlu1 %v780_v28 }
 0x1bf   : > { %v779_v37 = vpop.xlane.xlu1 %778 }
 0x1c0   : > { %v783_v38 = vmul.f32 %v779_v37, %v1879_v18 }
 0x1c2   : > { %v785_v39 = vadd.f32 1e-05, %v783_v38 }
 0x1c4   : > { %1596 = vrsqrt.f32 %v785_v39  ;;  %vm793_vm11 = vweird.f32 %v785_v39 }
 0x1c7   : > { %v782_v43 = vpop.xlane.xlu1 %781 }
 0x1c8   : > { %v784_v44 = vmul.f32 %v782_v43, %v1879_v18 }
 0x1ca   : > { %v1597_v46 = vpop.eup %1596  ;;  %v786_v47 = vadd.f32 1e-05, %v784_v44 }
 0x1cb   : > { %v788_v48 = vmul.f32 %v1597_v46, %v785_v39  ;;  %vm794_vm10 = vweird.f32 %v1597_v46 }
 0x1cc   : > { %1598 = vrsqrt.f32 %v786_v47  ;;  %vm795_vm12 = vmor %vm793_vm11, %vm794_vm10  ;;  %vm803_vm14 = vweird.f32 %v786_v47 }
 0x1cd   : > { %v789_v49 = vmul.f32 %v1597_v46, %v788_v48 }
 0x1cf   : > { %v790_v50 = vmul.f32 0.5, %v789_v49 }
 0x1d1   : > { %v791_v51 = vsub.f32 1.5, %v790_v50 }
 0x1d2   : > { %v1599_v53 = vpop.eup %1598 }
 0x1d3   : > { %v792_v54 = vmul.f32 %v1597_v46, %v791_v51  ;;  %v798_v55 = vmul.f32 %v1599_v53, %v786_v47  ;;  %vm804_vm13 = vweird.f32 %v1599_v53 }
 0x1d4   : > { %vm805_vm15 = vmor %vm803_vm14, %vm804_vm13 }
 0x1d5   : > { %v796_v57 = vsel %vm795_vm12, %v1597_v46, %v792_v54  ;;  %v799_v58 = vmul.f32 %v1599_v53, %v798_v55 }
 0x1d6   : > { %v807_v59 = vmul.f32 %v796_v57, %v773_v21 }
 0x1d7   : > { %v800_v61 = vmul.f32 0.5, %v799_v58 }
 0x1d8   : > { %v810_v62 = vmul.f32 %v809_v56, %v807_v59 }
 0x1d9   : > { %v801_v63 = vsub.f32 1.5, %v800_v61 }
 0x1da   : > { %v813_v1 = vadd.f32 %v812_v60, %v810_v62 }
 0x1db   : > { %v802_v2 = vmul.f32 %v1599_v53, %v801_v63 }
 0x1dc   : > { %1522 = vmatmul.msk.f32.vlgmr.msra.gmra.mxu2 %vm757_vm4, %v813_v1  ;;  %1529 = vmatmul.msk.f32.vlgmr.msra.gmra.mxu3 %vm757_vm4, %v813_v1 }
 0x1dd   : > { %v806_v3 = vsel %vm805_vm15, %v1599_v53, %v802_v2 }
 0x1de   : > { %v808_v4 = vmul.f32 %v806_v3, %v1886_v26 }
 0x1e0   : > { %v811_v5 = vmul.f32 %v809_v56, %v808_v4  ;;  %v1033_v4 = vld [vmem:[%s2108_s6] sm:$0xff] }
 0x1e2   : > { %v814_v6 = vadd.f32 %v812_v60, %v811_v5 }
 0x1e4   : > { %1523 = vmatmul.msk.f32.gmra.mxu2 %vm757_vm4, %v814_v6  ;;  %1530 = vmatmul.msk.f32.gmra.mxu3 %vm757_vm4, %v814_v6 }
 0x1ec   : > { %1536 = vmatmul.msk.f32.vlgmr.msrb.gmra.mxu2 %vm757_vm4, %v813_v1 }
 0x1f4   : > { %1537 = vmatmul.msk.f32.gmra.mxu2 %vm757_vm4, %v814_v6 }
 0x25f   : > { %v846_v7 = vpop.f32.mrf.mxu2  ;;  %v879_v8 = vpop.f32.mrf.mxu3 }
 0x260   : > { %v880_v15 = vadd.f32 %v1577_v9, %v879_v8  ;;  %v847_v16 = vadd.f32 %v1576_v14, %v846_v7  ;;  %v1579_v7 = vld [vmem:[%s2109_s7] ss:$0 sm:$0xff] }
 0x267   : > { %v849_v11 = vpop.f32.mrf.mxu2  ;;  %v882_v12 = vpop.f32.mrf.mxu3 }
 0x268   : > { %v883_v13 = vadd.f32 %v1577_v9, %v882_v12  ;;  %v850_v20 = vadd.f32 %v1576_v14, %v849_v11 }
 0x26a   : > { %1538 = vmatpush.xpose.msk.msrb.mxu3 %vm757_vm4, %v883_v13 }
 0x26e   : > { %1539 = vmatpush.xpose.msk.msrb.mxu3 %vm757_vm4, %v880_v15 }
 0x26f   : > { %v912_v17 = vpop.f32.mrf.mxu2 }
 0x270   : > { %v913_v23 = vadd.f32 %v1578_v19, %v912_v17 }
 0x271   : > { %1540 = vmatmul.msk.f32.vlgmr.msrb.gmra.mxu3 %vm757_vm4, %v847_v16 }
 0x272   : > { %1059 = vmatpush.msra.mxu3 %v1036_v40 }
 0x274   : > { %1060 = vmatpush.msra.mxu3 %v1035_v41  ;;  %v1072_v41 = vld [vmem:[%s2110_s8] sm:$0x3] }
 0x276   : > { %1061 = vmatpush.msra.mxu3 %v1034_v42 }
 0x277   : > { %v915_v21 = vpop.f32.mrf.mxu2 }
 0x278   : > { %v916_v22 = vadd.f32 %v1578_v19, %v915_v21  ;;  %1062 = vmatpush.msra.mxu3 %v1033_v4 }
 0x279   : > { %1541 = vmatmul.msk.f32.gmra.mxu3 %vm757_vm4, %v850_v20 }
 0x27a   : > { %1024 = vmatpush.msra.mxu2 %v916_v22 }
 0x27c   : > { %1025 = vmatpush.msra.mxu2 %v913_v23 }
 0x2f4   : > { %v947_v24 = vpop.f32.mrf.mxu3 }
 0x2f5   : > { %v953_v25 = vmul.f32 0.17677669, %v947_v24 }
 0x2f7   : > { %v956_v26 = vsel %vm955_vm0, %v953_v25, -inf }
 0x2f8   : > { %957 = vmax.xlane.f32.xlu2 %v956_v26  ;;  %v1126_v26 = vld [vmem:[%s2111_s9 + $0x18] sm:$0xff] }
 0x2f9   : > { %1149 = vmatpush.msrb.mxu0 %v1126_v26 }
 0x2fc   : > { %v950_v27 = vpop.f32.mrf.mxu3 }
 0x2fd   : > { %v954_v28 = vmul.f32 0.17677669, %v950_v27  ;;  %v1125_v27 = vld [vmem:[%s2111_s9 + $0x10] sm:$0xff] }
 0x2fe   : > { %1150 = vmatpush.msrb.mxu0 %v1125_v27 }
 0x2ff   : > { %v959_v29 = vsel %vm955_vm0, %v954_v28, -inf }
 0x300   : > { %960 = vmax.xlane.f32.xlu2 %v959_v29  ;;  %v1123_v29 = vld [vmem:[%s2111_s9] sm:$0xff] }
 0x36b   : > { %v958_v30 = vpop.xlane.xlu2 %957 }
 0x36c   : > { %v962_v31 = vsub.f32 %v953_v25, %v958_v30 }
 0x36e   : > { %v964_v32 = vmul.f32 1.442695, %v962_v31 }
 0x370   : > { %1600 = vpow2.f32 %v964_v32 }
 0x373   : > { %v961_v33 = vpop.xlane.xlu2 %960 }
 0x374   : > { %v963_v34 = vsub.f32 %v954_v28, %v961_v33  ;;  %v1124_v28 = vld [vmem:[%s2111_s9 + $0x8] sm:$0xff] }
 0x375   : > { %1151 = vmatpush.msrb.mxu0 %v1124_v28 }
 0x376   : > { %v1601_v35 = vpop.eup %1600  ;;  %v966_v36 = vmul.f32 1.442695, %v963_v34 }
 0x377   : > { %v968_v37 = vsel %vm955_vm0, %v1601_v35, 0.0  ;;  %1152 = vmatpush.msrb.mxu0 %v1123_v29 }
 0x378   : > { %1602 = vpow2.f32 %v966_v36  ;;  %969 = vadd.xlane.f32.xlu0 %v968_v37 }
 0x37e   : > { %v1603_v38 = vpop.eup %1602 }
 0x37f   : > { %v971_v39 = vsel %vm955_vm0, %v1603_v38, 0.0 }
 0x380   : > { %972 = vadd.xlane.f32.xlu1 %v971_v39 }
 0x3eb   : > { %v970_v43 = vpop.xlane.xlu0 %969 }
 0x3ec   : > { %1604 = vrcp.f32 %v970_v43  ;;  %v985_v48 = vand.u32 2147483648, %v970_v43  ;;  %v983_v50 = vand.u32 2147483647, %v970_v43  ;;  %vm979_vm2 = vweird.f32 %v970_v43 }
 0x3ee   : > { %v986_v53 = vor.u32 1.1754944e-38, %v985_v48  ;;  %vm984_vm5 = vcmp.eq.f32.partialorder %v983_v50, 8.507059e+37  ;;  %v1120_v48 = vperm.slane %v1072_v41, 1 }
 0x3f2   : > { %v1605_v44 = vpop.eup %1604 }
 0x3f3   : > { %v975_v45 = vmul.f32 %v1605_v44, %v970_v43  ;;  %v973_v46 = vpop.xlane.xlu1 %972  ;;  %vm980_vm1 = vweird.f32 %v1605_v44 }
 0x3f4   : > { %1606 = vrcp.f32 %v973_v46  ;;  %vm981_vm3 = vmor %vm979_vm2, %vm980_vm1  ;;  %v1000_v59 = vand.u32 2147483648, %v973_v46  ;;  %v998_v61 = vand.u32 2147483647, %v973_v46  ;;  %vm994_vm7 = vweird.f32 %v973_v46 }
 0x3f5   : > { %v976_v47 = vsub.f32 1.0, %v975_v45  ;;  %v1117_v45 = vperm.slane %v1072_v41, 0  ;;  %v1244_v41 = vld [vmem:[%s2115_s13] sm:$0xff] }
 0x3f6   : > { %v1001_v63 = vor.u32 1.1754944e-38, %v1000_v59  ;;  %vm999_vm9 = vcmp.eq.f32.partialorder %v998_v61, 8.507059e+37  ;;  %v1206_v59 = vld [vmem:[%s2113_s11 + $0x30] sm:$0xff]  ;;  %v1204_v61 = vld [vmem:[%s2113_s11 + $0x20] sm:$0xff] }
 0x3f7   : > { %v977_v49 = vmul.f32 %v1605_v44, %v976_v47 }
 0x3f9   : > { %v978_v51 = vadd.f32 %v1605_v44, %v977_v49 }
 0x3fa   : > { %v1607_v52 = vpop.eup %1606 }
 0x3fb   : > { %v982_v54 = vsel %vm981_vm3, %v1605_v44, %v978_v51  ;;  %v990_v55 = vmul.f32 %v1607_v52, %v973_v46  ;;  %vm995_vm6 = vweird.f32 %v1607_v52 }
 0x3fc   : > { %v987_v56 = vsel %vm984_vm5, %v986_v53, %v982_v54  ;;  %vm996_vm8 = vmor %vm994_vm7, %vm995_vm6  ;;  %vm1212_vm5 = vcmask 523264  }
 0x3fd   : > { %v991_v57 = vsub.f32 1.0, %v990_v55  ;;  %v988_v58 = vmul.f32 %v1601_v35, %v987_v56 }
 0x3ff   : > { %v992_v60 = vmul.f32 %v1607_v52, %v991_v57  ;;  %1542 = vmatmul.msk.f32.vlgmr.msra.gmra.mxu2 %vm955_vm0, %v988_v58  ;;  %v1207_v58 = vld [vmem:[%s2113_s11 + $0x38] sm:$0xff] }
 0x400   : > { %1227 = vmatpush.msrb.mxu1 %v1207_v58 }
 0x401   : > { %v993_v62 = vadd.f32 %v1607_v52, %v992_v60  ;;  %v1205_v60 = vld [vmem:[%s2113_s11 + $0x28] sm:$0xff] }
 0x402   : > { %1228 = vmatpush.msrb.mxu1 %v1206_v59 }
 0x403   : > { %v997_v1 = vsel %vm996_vm8, %v1607_v52, %v993_v62  ;;  %v1203_v62 = vld [vmem:[%s2113_s11 + $0x18] sm:$0xff] }
 0x404   : > { %v1002_v2 = vsel %vm999_vm9, %v1001_v63, %v997_v1  ;;  %1229 = vmatpush.msrb.mxu1 %v1205_v60  ;;  %v1202_v63 = vld [vmem:[%s2113_s11 + $0x10] sm:$0xff]  ;;  %v1580_v1 = vld [vmem:[%s2112_s10] ss:$0 sm:$0xff] }
 0x405   : > { %v1003_v3 = vmul.f32 %v1603_v38, %v1002_v2  ;;  %v1201_v2 = vld [vmem:[%s2113_s11 + $0x8] sm:$0xff] }
 0x406   : > { %1230 = vmatpush.msrb.mxu1 %v1204_v61 }
 0x407   : > { %1543 = vmatmul.msk.f32.gmra.mxu2 %vm955_vm0, %v1003_v3  ;;  %v1200_v3 = vld [vmem:[%s2113_s11] sm:$0xff] }
 0x408   : > { %1231 = vmatpush.msrb.mxu1 %v1203_v62 }
 0x40a   : > { %1232 = vmatpush.msrb.mxu1 %v1202_v63 }
 0x40c   : > { %1233 = vmatpush.msrb.mxu1 %v1201_v2 }
 0x40e   : > { %1234 = vmatpush.msrb.mxu1 %v1200_v3 }
 0x482   : > { %v1027_v5 = vpop.f32.mrf.mxu2 }
 0x483   : > { %1544 = vmatmul.msk.f32.vlgmr.msra.gmra.mxu3 %vm757_vm4, %v1027_v5 }
 0x48a   : > { %v1030_v6 = vpop.f32.mrf.mxu2 }
 0x48b   : > { %1545 = vmatmul.msk.f32.gmra.mxu3 %vm757_vm4, %v1030_v6 }
 0x506   : > { %v1064_v8 = vpop.f32.mrf.mxu3 }
 0x507   : > { %v1065_v9 = vadd.f32 %v1579_v7, %v1064_v8 }
 0x509   : > { %v1976_v11 = vadd.f32 %v1065_v9, %v1871_v0  ;;  %v1247_v9 = vld [vmem:[%s2115_s13 + $0x18] sm:$0xff] }
 0x50a   : > { %1270 = vmatpush.msrb.mxu2 %v1247_v9 }
 0x50b   : > { %v1073_v12 = vsel %vm757_vm4, %v1976_v11, 0.0 }
 0x50c   : > { %1074 = vadd.xlane.f32.xlu2 %v1073_v12 }
 0x50e   : > { %v1067_v13 = vpop.f32.mrf.mxu3 }
 0x50f   : > { %v1068_v14 = vadd.f32 %v1579_v7, %v1067_v13 }
 0x511   : > { %v1981_v15 = vadd.f32 %v1068_v14, %v1875_v10 }
 0x513   : > { %v1076_v16 = vsel %vm757_vm4, %v1981_v15, 0.0 }
 0x514   : > { %1077 = vadd.xlane.f32.xlu0 %v1076_v16 }
 0x57f   : > { %v1075_v17 = vpop.xlane.xlu2 %1074 }
 0x580   : > { %v1079_v19 = vmul.f32 %v1075_v17, %v1879_v18 }
 0x582   : > { %v1081_v20 = vsub.f32 %v1976_v11, %v1079_v19 }
 0x584   : > { %v1083_v0 = vmul.f32 %v1081_v20, %v1081_v20 }
 0x586   : > { %v1085_v21 = vsel %vm757_vm4, %v1083_v0, 0.0 }
 0x587   : > { %v1078_v22 = vpop.xlane.xlu0 %1077  ;;  %1086 = vadd.xlane.f32.xlu1 %v1085_v21 }
 0x588   : > { %v1080_v23 = vmul.f32 %v1078_v22, %v1879_v18 }
 0x58a   : > { %v1082_v24 = vsub.f32 %v1981_v15, %v1080_v23 }
 0x58c   : > { %v1084_v10 = vmul.f32 %v1082_v24, %v1082_v24 }
 0x58e   : > { %v1088_v25 = vsel %vm757_vm4, %v1084_v10, 0.0 }
 0x58f   : > { %1089 = vadd.xlane.f32.xlu2 %v1088_v25 }
 0x5fa   : > { %v1087_v30 = vpop.xlane.xlu1 %1086 }
 0x5fb   : > { %v1091_v31 = vmul.f32 %v1087_v30, %v1879_v18 }
 0x5fd   : > { %v1093_v32 = vadd.f32 1e-05, %v1091_v31 }
 0x5ff   : > { %1608 = vrsqrt.f32 %v1093_v32  ;;  %vm1101_vm11 = vweird.f32 %v1093_v32 }
 0x602   : > { %v1090_v33 = vpop.xlane.xlu2 %1089 }
 0x603   : > { %v1092_v34 = vmul.f32 %v1090_v33, %v1879_v18 }
 0x605   : > { %v1609_v35 = vpop.eup %1608  ;;  %v1094_v36 = vadd.f32 1e-05, %v1092_v34 }
 0x606   : > { %v1096_v37 = vmul.f32 %v1609_v35, %v1093_v32  ;;  %vm1102_vm10 = vweird.f32 %v1609_v35 }
 0x607   : > { %1610 = vrsqrt.f32 %v1094_v36  ;;  %vm1103_vm12 = vmor %vm1101_vm11, %vm1102_vm10  ;;  %vm1111_vm14 = vweird.f32 %v1094_v36 }
 0x608   : > { %v1097_v38 = vmul.f32 %v1609_v35, %v1096_v37 }
 0x60a   : > { %v1098_v39 = vmul.f32 0.5, %v1097_v38 }
 0x60c   : > { %v1099_v40 = vsub.f32 1.5, %v1098_v39  ;;  %v1246_v39 = vld [vmem:[%s2115_s13 + $0x10] sm:$0xff] }
 0x60d   : > { %v1611_v42 = vpop.eup %1610  ;;  %1271 = vmatpush.msrb.mxu2 %v1246_v39 }
 0x60e   : > { %v1100_v43 = vmul.f32 %v1609_v35, %v1099_v40  ;;  %v1106_v44 = vmul.f32 %v1611_v42, %v1094_v36  ;;  %vm1112_vm13 = vweird.f32 %v1611_v42  ;;  %v1245_v40 = vld [vmem:[%s2115_s13 + $0x8] sm:$0xff] }
 0x60f   : > { %vm1113_vm15 = vmor %vm1111_vm14, %vm1112_vm13  ;;  %1272 = vmatpush.msrb.mxu2 %v1245_v40 }
 0x610   : > { %v1104_v46 = vsel %vm1103_vm12, %v1609_v35, %v1100_v43  ;;  %v1107_v18 = vmul.f32 %v1611_v42, %v1106_v44 }
 0x611   : > { %v1115_v47 = vmul.f32 %v1104_v46, %v1081_v20  ;;  %1273 = vmatpush.msrb.mxu2 %v1244_v41 }
 0x612   : > { %v1108_v49 = vmul.f32 0.5, %v1107_v18 }
 0x613   : > { %v1118_v50 = vmul.f32 %v1117_v45, %v1115_v47 }
 0x614   : > { %v1109_v51 = vsub.f32 1.5, %v1108_v49  ;;  %v1323_v49 = vld [vmem:[%s2117_s15 + $0x10] sm:$0xff] }
 0x615   : > { %v1121_v52 = vadd.f32 %v1120_v48, %v1118_v50  ;;  %v1321_v50 = vld [vmem:[%s2117_s15] sm:$0xff] }
 0x616   : > { %v1110_v53 = vmul.f32 %v1611_v42, %v1109_v51 }
 0x617   : > { %1546 = vmatmul.msk.f32.vlgmr.msrb.gmra.mxu0 %vm757_vm4, %v1121_v52 }
 0x618   : > { %v1114_v54 = vsel %vm1113_vm15, %v1611_v42, %v1110_v53  ;;  %v1581_v42 = vld [vmem:[%s2114_s12] ss:$0 sm:$0xff] }
 0x619   : > { %v1116_v55 = vmul.f32 %v1114_v54, %v1082_v24 }
 0x61b   : > { %v1119_v56 = vmul.f32 %v1117_v45, %v1116_v55 }
 0x61d   : > { %v1122_v57 = vadd.f32 %v1120_v48, %v1119_v56  ;;  %v1324_v48 = vld [vmem:[%s2117_s15 + $0x18] sm:$0xff] }
 0x61e   : > { %1347 = vmatpush.msrb.mxu3 %v1324_v48 }
 0x61f   : > { %1547 = vmatmul.msk.f32.gmra.mxu0 %vm757_vm4, %v1122_v57 }
 0x620   : > { %1348 = vmatpush.msrb.mxu3 %v1323_v49 }
 0x694   : > { %v1154_v4 = vpop.f32.mrf.mxu0 }
 0x695   : > { %v1155_v5 = vadd.f32 %v1580_v1, %v1154_v4 }
 0x697   : > { %v1548_v6 = vmul.f32 -1.442695, %v1155_v5 }
 0x699   : > { %1612 = vpow2.f32 %v1548_v6 }
 0x69c   : > { %v1157_v7 = vpop.f32.mrf.mxu0 }
 0x69d   : > { %v1158_v8 = vadd.f32 %v1580_v1, %v1157_v7 }
 0x69f   : > { %v1613_v12 = vpop.eup %1612  ;;  %v1549_v13 = vmul.f32 -1.442695, %v1158_v8 }
 0x6a0   : > { %v1166_v14 = vadd.f32 1.0, %v1613_v12 }
 0x6a1   : > { %1614 = vpow2.f32 %v1549_v13 }
 0x6a2   : > { %1616 = vrcp.f32 %v1166_v14  ;;  %v1179_v21 = vand.u32 2147483648, %v1166_v14  ;;  %v1177_v23 = vand.u32 2147483647, %v1166_v14  ;;  %vm1173_vm1 = vweird.f32 %v1166_v14 }
 0x6a4   : > { %v1180_v25 = vor.u32 1.1754944e-38, %v1179_v21  ;;  %vm1178_vm3 = vcmp.eq.f32.partialorder %v1177_v23, 8.507059e+37  ;;  %v1583_v23 = vld [vmem:[%s2118_s16] ss:$0 sm:$0xff] }
 0x6a7   : > { %v1615_v16 = vpop.eup %1614 }
 0x6a8   : > { %v1617_v17 = vpop.eup %1616  ;;  %v1167_v19 = vadd.f32 1.0, %v1615_v16 }
 0x6a9   : > { %v1169_v20 = vmul.f32 %v1617_v17, %v1166_v14  ;;  %vm1174_vm0 = vweird.f32 %v1617_v17 }
 0x6aa   : > { %1618 = vrcp.f32 %v1167_v19  ;;  %vm1175_vm2 = vmor %vm1173_vm1, %vm1174_vm0  ;;  %v1194_v31 = vand.u32 2147483648, %v1167_v19  ;;  %v1192_v33 = vand.u32 2147483647, %v1167_v19  ;;  %vm1188_vm7 = vweird.f32 %v1167_v19 }
 0x6ab   : > { %v1170_v0 = vsub.f32 1.0, %v1169_v20 }
 0x6ac   : > { %v1195_v35 = vor.u32 1.1754944e-38, %v1194_v31  ;;  %vm1193_vm9 = vcmp.eq.f32.partialorder %v1192_v33, 8.507059e+37 }
 0x6ad   : > { %v1171_v22 = vmul.f32 %v1617_v17, %v1170_v0 }
 0x6af   : > { %v1172_v24 = vadd.f32 %v1617_v17, %v1171_v22 }
 0x6b0   : > { %v1619_v10 = vpop.eup %1618 }
 0x6b1   : > { %v1176_v26 = vsel %vm1175_vm2, %v1617_v17, %v1172_v24  ;;  %v1184_v27 = vmul.f32 %v1619_v10, %v1167_v19  ;;  %vm1189_vm6 = vweird.f32 %v1619_v10 }
 0x6b2   : > { %v1181_v28 = vsel %vm1178_vm3, %v1180_v25, %v1176_v26  ;;  %vm1190_vm8 = vmor %vm1188_vm7, %vm1189_vm6  ;;  %v1584_v25 = vld [vmem:[%s2119_s17] ss:$0 sm:$0xff] }
 0x6b3   : > { %v1198_v29 = vmul.f32 %v1181_v28, %v1155_v5  ;;  %v1185_v30 = vsub.f32 1.0, %v1184_v27 }
 0x6b5   : > { %v1186_v32 = vmul.f32 %v1619_v10, %v1185_v30  ;;  %1550 = vmatmul.msk.f32.vlgmr.msrb.gmra.mxu1 %vm1212_vm5, %v1198_v29 }
 0x6b7   : > { %v1187_v34 = vadd.f32 %v1619_v10, %v1186_v32 }
 0x6b9   : > { %v1191_v36 = vsel %vm1190_vm8, %v1619_v10, %v1187_v34  ;;  %v1645_v34 = vmov 0  }
 0x6ba   : > { %v1196_v37 = vsel %vm1193_vm9, %v1195_v35, %v1191_v36  ;;  %1573 = vset.pattern.permute.xlu2 %v1645_v34  ;;  %1574 = vset.pattern.permute.xlu0 %v1645_v34  ;;  %v1585_v35 = vld [vmem:[#allocation2] ss:$0 sm:$0xff] }
 0x6bb   : > { %v1199_v38 = vmul.f32 %v1196_v37, %v1158_v8 }
 0x6bd   : > { %1551 = vmatmul.msk.f32.gmra.mxu1 %vm1212_vm5, %v1199_v38 }
 0x732   : > { %v1236_v43 = vpop.f32.mrf.mxu1 }
 0x733   : > { %v1237_v44 = vadd.f32 %v1581_v42, %v1236_v43 }
 0x735   : > { %v1242_v45 = vadd.f32 %v1237_v44, %v1976_v11  ;;  %v1582_v11 = vld [vmem:[%s2116_s14] ss:$0 sm:$0xff] }
 0x737   : > { %1552 = vmatmul.msk.f32.vlgmr.msrb.gmra.mxu2 %vm757_vm4, %v1242_v45 }
 0x73a   : > { %v1239_v46 = vpop.f32.mrf.mxu1 }
 0x73b   : > { %v1240_v18 = vadd.f32 %v1581_v42, %v1239_v46 }
 0x73d   : > { %v1243_v47 = vadd.f32 %v1240_v18, %v1981_v15  ;;  %v1322_v15 = vld [vmem:[%s2117_s15 + $0x8] sm:$0xff] }
 0x73e   : > { %1349 = vmatpush.msrb.mxu3 %v1322_v15 }
 0x73f   : > { %1553 = vmatmul.msk.f32.gmra.mxu2 %vm757_vm4, %v1243_v47 }
 0x740   : > { %1350 = vmatpush.msrb.mxu3 %v1321_v50 }
 0x7ba   : > { %v1275_v51 = vpop.f32.mrf.mxu2 }
 0x7bb   : > { %v1276_v52 = vadd.f32 %v1582_v11, %v1275_v51 }
 0x7bd   : > { %v1554_v53 = vmul.f32 -1.442695, %v1276_v52 }
 0x7bf   : > { %1620 = vpow2.f32 %v1554_v53 }
 0x7c2   : > { %v1278_v54 = vpop.f32.mrf.mxu2 }
 0x7c3   : > { %v1279_v55 = vadd.f32 %v1582_v11, %v1278_v54 }
 0x7c5   : > { %v1621_v56 = vpop.eup %1620  ;;  %v1555_v57 = vmul.f32 -1.442695, %v1279_v55 }
 0x7c6   : > { %v1287_v58 = vadd.f32 1.0, %v1621_v56 }
 0x7c7   : > { %1622 = vpow2.f32 %v1555_v57 }
 0x7c8   : > { %1624 = vrcp.f32 %v1287_v58  ;;  %v1300_v1 = vand.u32 2147483648, %v1287_v58  ;;  %v1298_v3 = vand.u32 2147483647, %v1287_v58  ;;  %vm1294_vm11 = vweird.f32 %v1287_v58 }
 0x7ca   : > { %v1301_v6 = vor.u32 1.1754944e-38, %v1300_v1  ;;  %vm1299_vm13 = vcmp.eq.f32.partialorder %v1298_v3, 8.507059e+37  ;;  %v1417_v1 = vld [vmem:[%s2121_s19 + $0x8] sm:$0xff]  ;;  %v1418_v3 = vld [vmem:[%s2121_s19 + $0x10] sm:$0xff] }
 0x7cd   : > { %v1623_v59 = vpop.eup %1622 }
 0x7ce   : > { %v1625_v60 = vpop.eup %1624  ;;  %v1288_v61 = vadd.f32 1.0, %v1623_v59 }
 0x7cf   : > { %v1290_v62 = vmul.f32 %v1625_v60, %v1287_v58  ;;  %vm1295_vm10 = vweird.f32 %v1625_v60 }
 0x7d0   : > { %1626 = vrcp.f32 %v1288_v61  ;;  %vm1296_vm12 = vmor %vm1294_vm11, %vm1295_vm10  ;;  %v1315_v14 = vand.u32 2147483648, %v1288_v61  ;;  %v1313_v17 = vand.u32 2147483647, %v1288_v61  ;;  %vm1309_vm15 = vweird.f32 %v1288_v61 }
 0x7d1   : > { %v1291_v63 = vsub.f32 1.0, %v1290_v62  ;;  %vm1451_vm10 = vcmask 1040384  }
 0x7d2   : > { %v1316_v20 = vor.u32 1.1754944e-38, %v1315_v14  ;;  %vm1314_vm1 = vcmp.eq.f32.partialorder %v1313_v17, 8.507059e+37 }
 0x7d3   : > { %v1292_v2 = vmul.f32 %v1625_v60, %v1291_v63  ;;  %v1416_v63 = vld [vmem:[%s2121_s19] sm:$0xff] }
 0x7d5   : > { %v1293_v4 = vadd.f32 %v1625_v60, %v1292_v2 }
 0x7d6   : > { %v1627_v5 = vpop.eup %1626 }
 0x7d7   : > { %v1297_v7 = vsel %vm1296_vm12, %v1625_v60, %v1293_v4  ;;  %v1305_v8 = vmul.f32 %v1627_v5, %v1288_v61  ;;  %vm1310_vm14 = vweird.f32 %v1627_v5  ;;  %v1419_v4 = vld [vmem:[%s2121_s19 + $0x18] sm:$0xff] }
 0x7d8   : > { %v1302_v9 = vsel %vm1299_vm13, %v1301_v6, %v1297_v7  ;;  %vm1311_vm0 = vmor %vm1309_vm15, %vm1310_vm14 }
 0x7d9   : > { %v1319_v12 = vmul.f32 %v1302_v9, %v1276_v52  ;;  %v1306_v13 = vsub.f32 1.0, %v1305_v8 }
 0x7db   : > { %v1307_v16 = vmul.f32 %v1627_v5, %v1306_v13  ;;  %1556 = vmatmul.msk.f32.vlgmr.msrb.gmra.mxu3 %vm757_vm4, %v1319_v12 }
 0x7dd   : > { %v1308_v19 = vadd.f32 %v1627_v5, %v1307_v16 }
 0x7df   : > { %v1312_v0 = vsel %vm1311_vm0, %v1627_v5, %v1308_v19 }
 0x7e0   : > { %v1317_v21 = vsel %vm1314_vm1, %v1316_v20, %v1312_v0 }
 0x7e1   : > { %v1320_v22 = vmul.f32 %v1317_v21, %v1279_v55 }
 0x7e3   : > { %1557 = vmatmul.msk.f32.gmra.mxu3 %vm757_vm4, %v1320_v22 }
 0x85e   : > { %v1352_v24 = vpop.f32.mrf.mxu3 }
 0x85f   : > { %v1353_v10 = vadd.f32 %v1583_v23, %v1352_v24 }
 0x861   : > { %v1358_v26 = vmax.f32 %v1353_v10, 0.0 }
 0x863   : > { %v1364_v27 = vmul.f32 %v1584_v25, %v1358_v26 }
 0x865   : > { %v1366_v28 = vsel %vm757_vm4, %v1364_v27, 0.0 }
 0x866   : > { %1367 = vadd.xlane.f32.xlu0 %v1366_v28  ;;  %v1355_v29 = vpop.f32.mrf.mxu3 }
 0x867   : > { %v1356_v30 = vadd.f32 %v1583_v23, %v1355_v29  ;;  %v1454_v23 = vlaneseq }
 0x869   : > { %v1359_v31 = vmax.f32 %v1356_v30, 0.0  ;;  %vm1456_vm11 = vcmp.lt.s32.totalorder %v1454_v23, 256 }
 0x86b   : > { %v1365_v32 = vmul.f32 %v1584_v25, %v1359_v31 }
 0x86d   : > { %v1369_v33 = vsel %vm757_vm4, %v1365_v32, 0.0 }
 0x86e   : > { %1370 = vadd.xlane.f32.xlu1 %v1369_v33 }
 0x8d9   : > { %v1368_v36 = vpop.xlane.xlu0 %1367 }
 0x8da   : > { %v1376_v37 = vadd.f32 %v1585_v35, %v1368_v36 }
 0x8dc   : > { %v1558_v38 = vmul.f32 -1.442695, %v1376_v37 }
 0x8de   : > { %1628 = vpow2.f32 %v1558_v38 }
 0x8e1   : > { %v1371_v39 = vpop.xlane.xlu1 %1370 }
 0x8e2   : > { %v1377_v40 = vadd.f32 %v1585_v35, %v1371_v39 }
 0x8e4   : > { %v1629_v41 = vpop.eup %1628  ;;  %v1559_v42 = vmul.f32 -1.442695, %v1377_v40 }
 0x8e5   : > { %v1384_v43 = vadd.f32 1.0, %v1629_v41 }
 0x8e6   : > { %1630 = vpow2.f32 %v1559_v42 }
 0x8e7   : > { %1632 = vrcp.f32 %v1384_v43  ;;  %v1397_v48 = vand.u32 2147483648, %v1384_v43  ;;  %v1395_v11 = vand.u32 2147483647, %v1384_v43  ;;  %vm1391_vm2 = vweird.f32 %v1384_v43 }
 0x8e9   : > { %v1398_v51 = vor.u32 1.1754944e-38, %v1397_v48  ;;  %vm1396_vm5 = vcmp.eq.f32.partialorder %v1395_v11, 8.507059e+37 }
 0x8ec   : > { %v1631_v44 = vpop.eup %1630 }
 0x8ed   : > { %v1633_v45 = vpop.eup %1632  ;;  %v1385_v46 = vadd.f32 1.0, %v1631_v44 }
 0x8ee   : > { %v1387_v18 = vmul.f32 %v1633_v45, %v1384_v43  ;;  %vm1392_vm4 = vweird.f32 %v1633_v45 }
 0x8ef   : > { %1634 = vrcp.f32 %v1385_v46  ;;  %vm1393_vm3 = vmor %vm1391_vm2, %vm1392_vm4  ;;  %v1412_v56 = vand.u32 2147483648, %v1385_v46  ;;  %v1410_v58 = vand.u32 2147483647, %v1385_v46  ;;  %vm1406_vm7 = vweird.f32 %v1385_v46 }
 0x8f0   : > { %v1388_v47 = vsub.f32 1.0, %v1387_v18 }
 0x8f1   : > { %v1413_v60 = vor.u32 1.1754944e-38, %v1412_v56  ;;  %vm1411_vm9 = vcmp.eq.f32.partialorder %v1410_v58, 8.507059e+37 }
 0x8f2   : > { %v1389_v49 = vmul.f32 %v1633_v45, %v1388_v47 }
 0x8f4   : > { %v1390_v15 = vadd.f32 %v1633_v45, %v1389_v49 }
 0x8f5   : > { %v1635_v50 = vpop.eup %1634 }
 0x8f6   : > { %v1394_v52 = vsel %vm1393_vm3, %v1633_v45, %v1390_v15  ;;  %v1402_v53 = vmul.f32 %v1635_v50, %v1385_v46  ;;  %vm1407_vm6 = vweird.f32 %v1635_v50 }
 0x8f7   : > { %v1399_v54 = vsel %vm1396_vm5, %v1398_v51, %v1394_v52  ;;  %vm1408_vm8 = vmor %vm1406_vm7, %vm1407_vm6 }
 0x8f8   : > { %1422 = vperm.xlu2 %1573, %v1399_v54   ;;  %v1403_v55 = vsub.f32 1.0, %v1402_v53 }
 0x8fa   : > { %v1404_v57 = vmul.f32 %v1635_v50, %v1403_v55 }
 0x8fc   : > { %v1405_v59 = vadd.f32 %v1635_v50, %v1404_v57 }
 0x8fe   : > { %v1409_v61 = vsel %vm1408_vm8, %v1635_v50, %v1405_v59 }
 0x8ff   : > { %v1414_v62 = vsel %vm1411_vm9, %v1413_v60, %v1409_v61 }
 0x900   : > { %1427 = vperm.xlu0 %1574, %v1414_v62  }
 0x952   : > { %v1423_v2 = vpop.permute.xlu2 %1422 }
 0x953   : > { %v1430_v6 = vmul.f32 %v1423_v2, %v1416_v63  ;;  %v1431_v7 = vmul.f32 %v1423_v2, %v1417_v1 }
 0x972   : > { %v1428_v5 = vpop.permute.xlu0 %1427 }
 0x973   : > { %v1432_v8 = vmul.f32 %v1428_v5, %v1418_v3  ;;  %v1433_v9 = vmul.f32 %v1428_v5, %v1419_v4 }
 0x975   : > { %v1434_v12 = vadd.f32 %v1432_v8, %v1430_v6  ;;  %v1441_v13 = vadd.f32 %v1433_v9, %v1431_v7 }
 0x977   : > { %v1435_v14 = vrot.slane %v1434_v12, 4  ;;  %v1442_v16 = vrot.slane %v1441_v13, 4 }
 0x979   : > { %v1436_v17 = vadd.f32 %v1435_v14, %v1434_v12  ;;  %v1443_v19 = vadd.f32 %v1442_v16, %v1441_v13 }
 0x97b   : > { %v1437_v20 = vrot.slane %v1436_v17, 2  ;;  %v1444_v0 = vrot.slane %v1443_v19, 2 }
 0x97d   : > { %v1438_v21 = vadd.f32 %v1437_v20, %v1436_v17  ;;  %v1445_v22 = vadd.f32 %v1444_v0, %v1443_v19 }
 0x97f   : > { %v1439_v24 = vrot.slane %v1438_v21, 1  ;;  %v1446_v10 = vrot.slane %v1445_v22, 1 }
 0x981   : > { %v1447_v25 = vadd.f32 %v1446_v10, %v1445_v22  ;;  %v1440_v26 = vadd.f32 %v1439_v24, %v1438_v21 }
 0x983   : > { %v1450_v27 = vrot.slane %v1447_v25, 7 }
 0x985   : > { %v1452_v28 = vsel %vm1451_vm10, %v1440_v26, %v1450_v27 }
 0x986   : > { %1458 = vst.msk [vmem:[%s629_s28] sm:$0x3] %vm1456_vm11, %v1452_v28 }
 0x987 PF: > { %s32_s23 = sadd.s32 1, %s1642_s23  }
 0x988   : > { %p29_p4 = scmp.ge.s32.totalorder %s32_s23, 4  }
 0x98a   :  { %31 = sbr.rel (!%p29_p4) target bundleno = 6 (0x6), region = 134 }

</bundles_post_ra>
